<compile_context>
chip_gen: v7x
topology: tpu7x:2x2x1
jax: 0.10.0
libtpu: 0.0.40
codegen_flags: <defaults>
</compile_context>

<pallas_src>
from collections import namedtuple

import jax
import jax.numpy as jnp
from jax import lax
from jax.experimental import pallas as pl
from jax.experimental.pallas import tpu as pltpu

EncoderContext = namedtuple("EncoderContext",
                            ["decoder_hidden", "decoder_input_concat"])


# --------------------------------------------------------------------------
# Single fused kernel (one batch tile per grid step):
#   NextActionsEncoder matmul + tanh
#   GRU (hoisted fused-gate input projection + length-masked recurrence)
#   final linear + tanh of the last hidden state (lane-dense padded output)
# --------------------------------------------------------------------------
def encoder_kernel(x_ref, lens_ref,
                   w_ih_ref, w_hh_ref, b_ih_ref, b_hh_ref,
                   w_lin_ref, b_lin_ref,
                   na_ref, w_blk_ref, b_blk_ref,
                   dh_ref, dic_ref):
    T, TB, E = x_ref.shape
    H = w_hh_ref.shape[0]
    Gp = w_hh_ref.shape[1]            # padded 3H (multiple of 128)

    # ---- NextActionsEncoder: one lane-dense matmul (TB, NB*F)@(NB*F, Cp) ---
    blk = jnp.dot(na_ref[...], w_blk_ref[...],
                  preferred_element_type=jnp.float32)
    dic_ref[...] = jnp.tanh(blk + b_blk_ref[...]).astype(dic_ref.dtype)

    # ---- GRU: fused-gate input projection hoisted over the whole sequence --
    x2d = x_ref[...].reshape(T * TB, E)                      # bf16 rows
    gi = jnp.dot(x2d, w_ih_ref[...], preferred_element_type=jnp.float32)
    gi = (gi + b_ih_ref[...]).reshape(T, TB, Gp).astype(jnp.bfloat16)

    # Hoisted broadcasts (JAX does not CSE broadcast_in_dim inside the loop).
    bhh = jnp.broadcast_to(b_hh_ref[...], (TB, Gp)).astype(jnp.float32)
    lens_b = jnp.broadcast_to(lens_ref[...], (TB, H))        # f32 lengths
    w_hh = w_hh_ref[...]                                     # bf16 (H, Gp)

    def step(t, h):
        # One wide MXU issue per timestep for all three gates.
        gh = jnp.dot(h.astype(w_hh.dtype), w_hh,
                     preferred_element_type=jnp.float32) + bhh
        gi_t = gi[t].astype(jnp.float32)
        rz = jax.nn.sigmoid(gi_t[:, 0:2 * H] + gh[:, 0:2 * H])
        r = rz[:, 0:H]
        z = rz[:, H:2 * H]
        # PyTorch GRU: n = tanh(W_in x + b_in + r * (W_hn h + b_hn))
        n = jnp.tanh(gi_t[:, 2 * H:3 * H] + r * gh[:, 2 * H:3 * H])
        h_new = (1.0 - z) * n + z * h
        # pack_padded semantics: freeze hidden state once t >= length.
        return jnp.where(lens_b > t, h_new, h)

    h = jnp.zeros((TB, H), jnp.float32)
    if T <= 16:
        # Small static T: full unroll keeps the LLO scheduler's hands free.
        for t in range(T):
            h = step(t, h)
    else:
        # Larger T: bound live ranges / compile time with a rolled loop.
        h = lax.fori_loop(0, T, step, h, unroll=2)

    # ---- final linear + tanh (lane-dense padded output columns) -----------
    dh = jnp.dot(h.astype(w_lin_ref.dtype), w_lin_ref[...],
                 preferred_element_type=jnp.float32) + b_lin_ref[...]
    dh_ref[...] = jnp.tanh(dh).astype(dh_ref.dtype)


# --------------------------------------------------------------------------
# Parameter construction (deterministic, synthetic) + one-time preparation
# --------------------------------------------------------------------------
def init_params(key, *, vocab_size, tok_embed, rnn_hidden, linear_size,
                block_input_size, block_embedding_size):
    ks = jax.random.split(key, 9)
    scale = 0.1
    f32 = jnp.float32
    return {
        # PrevUtterancesEncoder (per-gate GRU weights, gate order r, z, n)
        "tok_embedding": scale * jax.random.normal(ks[0], (vocab_size, tok_embed), f32),
        "w_ih": scale * jax.random.normal(ks[1], (3, tok_embed, rnn_hidden), f32),
        "w_hh": scale * jax.random.normal(ks[2], (3, rnn_hidden, rnn_hidden), f32),
        "b_ih": scale * jax.random.normal(ks[3], (3, rnn_hidden), f32),
        "b_hh": scale * jax.random.normal(ks[4], (3, rnn_hidden), f32),
        "w_lin": scale * jax.random.normal(ks[5], (rnn_hidden, linear_size), f32),
        "b_lin": scale * jax.random.normal(ks[6], (linear_size,), f32),
        # NextActionsEncoder (block embedding layer, shared across blocks)
        "w_blk": scale * jax.random.normal(ks[7], (block_input_size, block_embedding_size), f32),
        "b_blk": scale * jax.random.normal(ks[8], (block_embedding_size,), f32),
    }


def _round_up(x, m):
    return ((x + m - 1) // m) * m


def prepare_params(params, *, num_blocks):
    """One-time derived-weight construction (NOT per forward call)."""
    E, H = params["w_ih"].shape[1], params["w_ih"].shape[2]
    L = params["w_lin"].shape[1]
    F, Eb = params["w_blk"].shape
    NB = num_blocks

    Gp = _round_up(3 * H, 128)           # fused gate width, lane-dense
    Lp = _round_up(L, 128)               # decoder_hidden width, lane-dense
    Cp = _round_up(NB * Eb, 128)         # decoder_input_concat width

    # Fused gate weights (E,3H)/(H,3H), padded to Gp columns.
    w_ih_cat = jnp.concatenate([params["w_ih"][g] for g in range(3)], axis=1)
    w_hh_cat = jnp.concatenate([params["w_hh"][g] for g in range(3)], axis=1)
    b_ih_cat = jnp.concatenate([params["b_ih"][g] for g in range(3)])[None, :]
    b_hh_cat = jnp.concatenate([params["b_hh"][g] for g in range(3)])[None, :]
    w_ih_cat = jnp.pad(w_ih_cat, ((0, 0), (0, Gp - 3 * H))).astype(jnp.bfloat16)
    w_hh_cat = jnp.pad(w_hh_cat, ((0, 0), (0, Gp - 3 * H))).astype(jnp.bfloat16)
    b_ih_cat = jnp.pad(b_ih_cat, ((0, 0), (0, Gp - 3 * H)))
    b_hh_cat = jnp.pad(b_hh_cat, ((0, 0), (0, Gp - 3 * H)))

    # Final linear padded to lane-dense output columns.
    w_lin_p = jnp.pad(params["w_lin"], ((0, 0), (0, Lp - L))).astype(jnp.bfloat16)
    b_lin_p = jnp.pad(params["b_lin"][None, :], ((0, 0), (0, Lp - L)))

    # Block-diagonal expansion of the shared block-embedding weight so the
    # whole NextActionsEncoder is one lane-dense (B, NB*F)@(NB*F, Cp) matmul.
    eye_nb = jnp.eye(NB, dtype=jnp.float32)
    w_blk_big = (eye_nb[:, None, :, None] *
                 params["w_blk"][None, :, None, :]).reshape(NB * F, NB * Eb)
    w_blk_big = jnp.pad(w_blk_big, ((0, 0), (0, Cp - NB * Eb))).astype(jnp.bfloat16)
    b_blk_big = jnp.pad(jnp.tile(params["b_blk"][None, :], (1, NB)),
                        ((0, 0), (0, Cp - NB * Eb)))

    return {
        "tok_embedding": params["tok_embedding"],
        "w_ih_cat": w_ih_cat, "w_hh_cat": w_hh_cat,
        "b_ih_cat": b_ih_cat, "b_hh_cat": b_hh_cat,
        "w_lin_p": w_lin_p, "b_lin_p": b_lin_p,
        "w_blk_big": w_blk_big, "b_blk_big": b_blk_big,
        "dims": dict(E=E, H=H, L=L, NB=NB, F=F, Eb=Eb, Gp=Gp, Lp=Lp, Cp=Cp),
    }


def _vmem_limit_bytes(T, tb, E, Gp, H, Lp, NAF, Cp):
    bf, f4 = 2, 4
    resident = (
        2 * T * tb * E * bf                                   # emb (dbl buf)
        + T * tb * Gp * bf                                    # bf16 gate proj
        + 2 * (E * Gp + H * Gp + H * Lp + NAF * Cp) * bf      # weights
        + 2 * (2 * Gp + Lp + Cp) * f4                         # biases
        + 2 * tb * f4 + 2 * tb * NAF * bf                     # lens + actions
        + 2 * (tb * Lp + tb * Cp) * f4                        # outputs
        + 6 * tb * Gp * f4                                    # gate working set
    )
    return int(min(100 * 1024 * 1024, max(16 * 1024 * 1024, 2 * resident)))


# --------------------------------------------------------------------------
# Forward pass (matches UtterancesAndNextActionsEncoder.forward)
# --------------------------------------------------------------------------
def utterances_and_next_actions_encoder(prepared, encoder_inputs):
    tokens = encoder_inputs["prev_utterance_tokens"]        # [B, T] int32
    lengths = encoder_inputs["prev_utterance_lengths"]      # [B]    int32
    next_actions = encoder_inputs["next_actions"]            # [B, NB, F] f32

    d = prepared["dims"]
    E, H, L = d["E"], d["H"], d["L"]
    NB, F, Eb = d["NB"], d["F"], d["Eb"]
    Gp, Lp, Cp = d["Gp"], d["Lp"], d["Cp"]
    NAF = NB * F

    B, T = tokens.shape

    # Batch tiling: up to 128 rows per tile (multiple of 8 sublanes).
    tb = min(128, _round_up(B, 8))
    Bp = _round_up(B, tb)
    pad_b = Bp - B

    tokens_p = jnp.pad(tokens, ((0, pad_b), (0, 0)))
    lengths_p = jnp.pad(lengths, (0, pad_b))                 # padded rows: len 0
    na_p = jnp.pad(next_actions, ((0, pad_b), (0, 0), (0, 0)))

    # Embedding lookup gathered directly in time-major layout [T, Bp, E]
    # (transpose happens on the tiny int token matrix, not the activations).
    emb_tbe = jnp.take(prepared["tok_embedding"], tokens_p.T, axis=0)
    emb_tbe = emb_tbe.astype(jnp.bfloat16)

    lens_f = lengths_p.astype(jnp.float32)[:, None]          # [Bp, 1]
    na_2d = na_p.reshape(Bp, NAF).astype(jnp.bfloat16)

    grid = (Bp // tb,)

    dh, dic = pl.pallas_call(
        encoder_kernel,
        out_shape=(jax.ShapeDtypeStruct((Bp, Lp), jnp.float32),
                   jax.ShapeDtypeStruct((Bp, Cp), jnp.float32)),
        grid_spec=pltpu.PrefetchScalarGridSpec(
            num_scalar_prefetch=0,
            grid=grid,
            in_specs=[
                pl.BlockSpec((T, tb, E), lambda b: (0, b, 0)),   # embeddings
                pl.BlockSpec((tb, 1), lambda b: (b, 0)),         # lengths
                pl.BlockSpec((E, Gp), lambda b: (0, 0)),         # w_ih_cat
                pl.BlockSpec((H, Gp), lambda b: (0, 0)),         # w_hh_cat
                pl.BlockSpec((1, Gp), lambda b: (0, 0)),         # b_ih_cat
                pl.BlockSpec((1, Gp), lambda b: (0, 0)),         # b_hh_cat
                pl.BlockSpec((H, Lp), lambda b: (0, 0)),         # w_lin
                pl.BlockSpec((1, Lp), lambda b: (0, 0)),         # b_lin
                pl.BlockSpec((tb, NAF), lambda b: (b, 0)),       # next actions
                pl.BlockSpec((NAF, Cp), lambda b: (0, 0)),       # w_blk_big
                pl.BlockSpec((1, Cp), lambda b: (0, 0)),         # b_blk_big
            ],
            out_specs=[
                pl.BlockSpec((tb, Lp), lambda b: (b, 0)),        # decoder_hidden
                pl.BlockSpec((tb, Cp), lambda b: (b, 0)),        # decoder_input_concat
            ],
        ),
        compiler_params=pltpu.CompilerParams(
            dimension_semantics=("parallel",),
            vmem_limit_bytes=_vmem_limit_bytes(T, tb, E, Gp, H, Lp, NAF, Cp),
        ),
    )(emb_tbe, lens_f,
      prepared["w_ih_cat"], prepared["w_hh_cat"],
      prepared["b_ih_cat"], prepared["b_hh_cat"],
      prepared["w_lin_p"], prepared["b_lin_p"],
      na_2d, prepared["w_blk_big"], prepared["b_blk_big"])

    return EncoderContext(decoder_hidden=dh[:B, :L],
                          decoder_input_concat=dic[:B, :NB * Eb])


# --------------------------------------------------------------------------
if __name__ == "__main__":
    B, T = 2, 8
    VOCAB, TOK_EMBED, RNN_HIDDEN, LINEAR_SIZE = 50, 32, 32, 32
    NB, BLOCK_F, BLOCK_E = 4, 16, 32

    root = jax.random.PRNGKey(0)
    k_param, k_tok, k_act = jax.random.split(root, 3)

    params = init_params(k_param,
                         vocab_size=VOCAB, tok_embed=TOK_EMBED,
                         rnn_hidden=RNN_HIDDEN, linear_size=LINEAR_SIZE,
                         block_input_size=BLOCK_F,
                         block_embedding_size=BLOCK_E)
    prepared = prepare_params(params, num_blocks=NB)   # one-time derived weights

    encoder_inputs = {
        "prev_utterance_tokens": jax.random.randint(
            k_tok, (B, T), 0, VOCAB, dtype=jnp.int32),
        "prev_utterance_lengths": jnp.array([T, 5], dtype=jnp.int32),
        "next_actions": jax.random.normal(k_act, (B, NB, BLOCK_F), jnp.float32),
    }

    ctx = utterances_and_next_actions_encoder(prepared, encoder_inputs)
    jax.block_until_ready(ctx.decoder_hidden)
    jax.block_until_ready(ctx.decoder_input_concat)

    assert ctx.decoder_hidden.shape == (B, LINEAR_SIZE)
    assert ctx.decoder_input_concat.shape == (B, NB * BLOCK_E)
    assert bool(jnp.all(jnp.isfinite(ctx.decoder_hidden)))
    assert bool(jnp.all(jnp.isfinite(ctx.decoder_input_concat)))
    print("KERNEL_OK")
</pallas_src>

<mosaic_0001>
module attributes {stable_mosaic.version = 11 : i64} {
  func.func @encoder_kernel(%arg0: i32, %arg1: memref<8x8x32xbf16, #tpu.memory_space<vmem>>, %arg2: memref<8x1xf32, #tpu.memory_space<vmem>>, %arg3: memref<32x128xbf16, #tpu.memory_space<vmem>>, %arg4: memref<32x128xbf16, #tpu.memory_space<vmem>>, %arg5: memref<1x128xf32, #tpu.memory_space<vmem>>, %arg6: memref<1x128xf32, #tpu.memory_space<vmem>>, %arg7: memref<32x128xbf16, #tpu.memory_space<vmem>>, %arg8: memref<1x128xf32, #tpu.memory_space<vmem>>, %arg9: memref<8x64xbf16, #tpu.memory_space<vmem>>, %arg10: memref<64x128xbf16, #tpu.memory_space<vmem>>, %arg11: memref<1x128xf32, #tpu.memory_space<vmem>>, %arg12: memref<8x128xf32, #tpu.memory_space<vmem>>, %arg13: memref<8x128xf32, #tpu.memory_space<vmem>>) attributes {dimension_semantics = [#tpu.dimension_semantics<parallel>], iteration_bounds = array<i64: 1>, scalar_prefetch = 0 : i64, scratch_operands = 0 : i64, tpu.core_type = #tpu.core_type<tc>, window_params = [{transform_indices = @transform_0, window_bounds = array<i64: 8, 8, 32>}, {transform_indices = @transform_1, window_bounds = array<i64: 8, 1>}, {pipeline_mode = #tpu.pipeline_mode<synchronous>, transform_indices = @transform_2, window_bounds = array<i64: 32, 128>}, {pipeline_mode = #tpu.pipeline_mode<synchronous>, transform_indices = @transform_3, window_bounds = array<i64: 32, 128>}, {pipeline_mode = #tpu.pipeline_mode<synchronous>, transform_indices = @transform_4, window_bounds = array<i64: 1, 128>}, {pipeline_mode = #tpu.pipeline_mode<synchronous>, transform_indices = @transform_5, window_bounds = array<i64: 1, 128>}, {pipeline_mode = #tpu.pipeline_mode<synchronous>, transform_indices = @transform_6, window_bounds = array<i64: 32, 128>}, {pipeline_mode = #tpu.pipeline_mode<synchronous>, transform_indices = @transform_7, window_bounds = array<i64: 1, 128>}, {transform_indices = @transform_8, window_bounds = array<i64: 8, 64>}, {pipeline_mode = #tpu.pipeline_mode<synchronous>, transform_indices = @transform_9, window_bounds = array<i64: 64, 128>}, {pipeline_mode = #tpu.pipeline_mode<synchronous>, transform_indices = @transform_10, window_bounds = array<i64: 1, 128>}, {transform_indices = @transform_11, window_bounds = array<i64: 8, 128>}, {transform_indices = @transform_12, window_bounds = array<i64: 8, 128>}]} {
    %c0 = arith.constant 0 : index
    %c0_0 = arith.constant 0 : index
    %0 = vector.load %arg9[%c0, %c0_0] : memref<8x64xbf16, #tpu.memory_space<vmem>>, vector<8x64xbf16>
    %c0_1 = arith.constant 0 : index
    %c0_2 = arith.constant 0 : index
    %1 = vector.load %arg10[%c0_1, %c0_2] : memref<64x128xbf16, #tpu.memory_space<vmem>>, vector<64x128xbf16>
    %cst = arith.constant dense<0.000000e+00> : vector<8x128xf32>
    %2 = tpu.matmul %0, %1, %cst {dimension_numbers = #tpu.dot_dimension_numbers<[1], [0], [0], [1], [0, 0, 1, 1], [], []>} : vector<8x64xbf16>, vector<64x128xbf16>, vector<8x128xf32> -> vector<8x128xf32>
    %c0_3 = arith.constant 0 : index
    %c0_4 = arith.constant 0 : index
    %3 = vector.load %arg11[%c0_3, %c0_4] : memref<1x128xf32, #tpu.memory_space<vmem>>, vector<1x128xf32>
    %4 = vector.broadcast %3 : vector<1x128xf32> to vector<8x128xf32>
    %5 = arith.addf %2, %4 : vector<8x128xf32>
    %6 = math.tanh %5 : vector<8x128xf32>
    %c0_5 = arith.constant 0 : index
    %c0_6 = arith.constant 0 : index
    %7 = vector.load %arg13[%c0_5, %c0_6] : memref<8x128xf32, #tpu.memory_space<vmem>>, vector<8x128xf32>
    tpu.vector_store %arg13[%c0_5, %c0_6], %6 {strides = array<i32>} : memref<8x128xf32, #tpu.memory_space<vmem>>, vector<8x128xf32>,
    %c0_7 = arith.constant 0 : index
    %c0_8 = arith.constant 0 : index
    %c0_9 = arith.constant 0 : index
    %8 = vector.load %arg1[%c0_7, %c0_8, %c0_9] : memref<8x8x32xbf16, #tpu.memory_space<vmem>>, vector<8x8x32xbf16>
    %9 = vector.shape_cast %8 : vector<8x8x32xbf16> to vector<64x32xbf16>
    %c0_10 = arith.constant 0 : index
    %c0_11 = arith.constant 0 : index
    %10 = vector.load %arg3[%c0_10, %c0_11] : memref<32x128xbf16, #tpu.memory_space<vmem>>, vector<32x128xbf16>
    %cst_12 = arith.constant dense<0.000000e+00> : vector<64x128xf32>
    %11 = tpu.matmul %9, %10, %cst_12 {dimension_numbers = #tpu.dot_dimension_numbers<[1], [0], [0], [1], [0, 0, 1, 1], [], []>} : vector<64x32xbf16>, vector<32x128xbf16>, vector<64x128xf32> -> vector<64x128xf32>
    %c0_13 = arith.constant 0 : index
    %c0_14 = arith.constant 0 : index
    %12 = vector.load %arg5[%c0_13, %c0_14] : memref<1x128xf32, #tpu.memory_space<vmem>>, vector<1x128xf32>
    %13 = vector.broadcast %12 : vector<1x128xf32> to vector<64x128xf32>
    %14 = arith.addf %11, %13 : vector<64x128xf32>
    %15 = vector.shape_cast %14 : vector<64x128xf32> to vector<8x8x128xf32>
    %16 = arith.truncf %15 : vector<8x8x128xf32> to vector<8x8x128xbf16>
    %c0_15 = arith.constant 0 : index
    %c0_16 = arith.constant 0 : index
    %17 = vector.load %arg6[%c0_15, %c0_16] : memref<1x128xf32, #tpu.memory_space<vmem>>, vector<1x128xf32>
    %18 = vector.shape_cast %17 : vector<1x128xf32> to vector<1x128xf32>
    %19 = vector.broadcast %18 : vector<1x128xf32> to vector<8x128xf32>
    %c0_17 = arith.constant 0 : index
    %c0_18 = arith.constant 0 : index
    %20 = vector.load %arg2[%c0_17, %c0_18] : memref<8x1xf32, #tpu.memory_space<vmem>>, vector<8x1xf32>
    %21 = vector.shape_cast %20 : vector<8x1xf32> to vector<8x1xf32>
    %22 = vector.broadcast %21 : vector<8x1xf32> to vector<8x32xf32>
    %c0_19 = arith.constant 0 : index
    %c0_20 = arith.constant 0 : index
    %23 = vector.load %arg4[%c0_19, %c0_20] : memref<32x128xbf16, #tpu.memory_space<vmem>>, vector<32x128xbf16>
    %cst_21 = arith.constant 0.000000e+00 : f32
    %24 = vector.broadcast %cst_21 : f32 to vector<8x32xf32>
    %25 = arith.truncf %24 : vector<8x32xf32> to vector<8x32xbf16>
    %cst_22 = arith.constant dense<0.000000e+00> : vector<8x128xf32>
    %26 = tpu.matmul %25, %23, %cst_22 {dimension_numbers = #tpu.dot_dimension_numbers<[1], [0], [0], [1], [0, 0, 1, 1], [], []>} : vector<8x32xbf16>, vector<32x128xbf16>, vector<8x128xf32> -> vector<8x128xf32>
    %27 = arith.addf %26, %19 : vector<8x128xf32>
    %28 = vector.extract_strided_slice %16 {offsets = [0, 0, 0], sizes = [1, 8, 128], strides = [1, 1, 1]} : vector<8x8x128xbf16> to vector<1x8x128xbf16>
    %29 = vector.shape_cast %28 : vector<1x8x128xbf16> to vector<8x128xbf16>
    %30 = arith.extf %29 : vector<8x128xbf16> to vector<8x128xf32>
    %31 = vector.extract_strided_slice %30 {offsets = [0, 0], sizes = [8, 64], strides = [1, 1]} : vector<8x128xf32> to vector<8x64xf32>
    %32 = vector.extract_strided_slice %27 {offsets = [0, 0], sizes = [8, 64], strides = [1, 1]} : vector<8x128xf32> to vector<8x64xf32>
    %33 = arith.addf %31, %32 : vector<8x64xf32>
    %34 = arith.negf %33 : vector<8x64xf32>
    %35 = math.exp %34 : vector<8x64xf32>
    %cst_23 = arith.constant 1.000000e+00 : f32
    %36 = vector.broadcast %cst_23 : f32 to vector<8x64xf32>
    %37 = arith.addf %36, %35 : vector<8x64xf32>
    %38 = arith.divf %36, %37 : vector<8x64xf32>
    %39 = vector.extract_strided_slice %38 {offsets = [0, 0], sizes = [8, 32], strides = [1, 1]} : vector<8x64xf32> to vector<8x32xf32>
    %40 = vector.extract_strided_slice %38 {offsets = [0, 32], sizes = [8, 32], strides = [1, 1]} : vector<8x64xf32> to vector<8x32xf32>
    %41 = vector.extract_strided_slice %30 {offsets = [0, 64], sizes = [8, 32], strides = [1, 1]} : vector<8x128xf32> to vector<8x32xf32>
    %42 = vector.extract_strided_slice %27 {offsets = [0, 64], sizes = [8, 32], strides = [1, 1]} : vector<8x128xf32> to vector<8x32xf32>
    %43 = arith.mulf %39, %42 : vector<8x32xf32>
    %44 = arith.addf %41, %43 : vector<8x32xf32>
    %45 = math.tanh %44 : vector<8x32xf32>
    %cst_24 = arith.constant 1.000000e+00 : f32
    %46 = vector.broadcast %cst_24 : f32 to vector<8x32xf32>
    %47 = arith.subf %46, %40 : vector<8x32xf32>
    %48 = arith.mulf %47, %45 : vector<8x32xf32>
    %49 = arith.mulf %40, %24 : vector<8x32xf32>
    %50 = arith.addf %48, %49 : vector<8x32xf32>
    %cst_25 = arith.constant 0.000000e+00 : f32
    %51 = vector.broadcast %cst_25 : f32 to vector<8x32xf32>
    %52 = arith.cmpf ogt, %22, %51 : vector<8x32xf32>
    %53 = arith.select %52, %50, %24 : vector<8x32xi1>, vector<8x32xf32>
    %54 = arith.truncf %53 : vector<8x32xf32> to vector<8x32xbf16>
    %cst_26 = arith.constant dense<0.000000e+00> : vector<8x128xf32>
    %55 = tpu.matmul %54, %23, %cst_26 {dimension_numbers = #tpu.dot_dimension_numbers<[1], [0], [0], [1], [0, 0, 1, 1], [], []>} : vector<8x32xbf16>, vector<32x128xbf16>, vector<8x128xf32> -> vector<8x128xf32>
    %56 = arith.addf %55, %19 : vector<8x128xf32>
    %57 = vector.extract_strided_slice %16 {offsets = [1, 0, 0], sizes = [1, 8, 128], strides = [1, 1, 1]} : vector<8x8x128xbf16> to vector<1x8x128xbf16>
    %58 = vector.shape_cast %57 : vector<1x8x128xbf16> to vector<8x128xbf16>
    %59 = arith.extf %58 : vector<8x128xbf16> to vector<8x128xf32>
    %60 = vector.extract_strided_slice %59 {offsets = [0, 0], sizes = [8, 64], strides = [1, 1]} : vector<8x128xf32> to vector<8x64xf32>
    %61 = vector.extract_strided_slice %56 {offsets = [0, 0], sizes = [8, 64], strides = [1, 1]} : vector<8x128xf32> to vector<8x64xf32>
    %62 = arith.addf %60, %61 : vector<8x64xf32>
    %63 = arith.negf %62 : vector<8x64xf32>
    %64 = math.exp %63 : vector<8x64xf32>
    %cst_27 = arith.constant 1.000000e+00 : f32
    %65 = vector.broadcast %cst_27 : f32 to vector<8x64xf32>
    %66 = arith.addf %65, %64 : vector<8x64xf32>
    %67 = arith.divf %65, %66 : vector<8x64xf32>
    %68 = vector.extract_strided_slice %67 {offsets = [0, 0], sizes = [8, 32], strides = [1, 1]} : vector<8x64xf32> to vector<8x32xf32>
    %69 = vector.extract_strided_slice %67 {offsets = [0, 32], sizes = [8, 32], strides = [1, 1]} : vector<8x64xf32> to vector<8x32xf32>
    %70 = vector.extract_strided_slice %59 {offsets = [0, 64], sizes = [8, 32], strides = [1, 1]} : vector<8x128xf32> to vector<8x32xf32>
    %71 = vector.extract_strided_slice %56 {offsets = [0, 64], sizes = [8, 32], strides = [1, 1]} : vector<8x128xf32> to vector<8x32xf32>
    %72 = arith.mulf %68, %71 : vector<8x32xf32>
    %73 = arith.addf %70, %72 : vector<8x32xf32>
    %74 = math.tanh %73 : vector<8x32xf32>
    %cst_28 = arith.constant 1.000000e+00 : f32
    %75 = vector.broadcast %cst_28 : f32 to vector<8x32xf32>
    %76 = arith.subf %75, %69 : vector<8x32xf32>
    %77 = arith.mulf %76, %74 : vector<8x32xf32>
    %78 = arith.mulf %69, %53 : vector<8x32xf32>
    %79 = arith.addf %77, %78 : vector<8x32xf32>
    %cst_29 = arith.constant 1.000000e+00 : f32
    %80 = vector.broadcast %cst_29 : f32 to vector<8x32xf32>
    %81 = arith.cmpf ogt, %22, %80 : vector<8x32xf32>
    %82 = arith.select %81, %79, %53 : vector<8x32xi1>, vector<8x32xf32>
    %83 = arith.truncf %82 : vector<8x32xf32> to vector<8x32xbf16>
    %cst_30 = arith.constant dense<0.000000e+00> : vector<8x128xf32>
    %84 = tpu.matmul %83, %23, %cst_30 {dimension_numbers = #tpu.dot_dimension_numbers<[1], [0], [0], [1], [0, 0, 1, 1], [], []>} : vector<8x32xbf16>, vector<32x128xbf16>, vector<8x128xf32> -> vector<8x128xf32>
    %85 = arith.addf %84, %19 : vector<8x128xf32>
    %86 = vector.extract_strided_slice %16 {offsets = [2, 0, 0], sizes = [1, 8, 128], strides = [1, 1, 1]} : vector<8x8x128xbf16> to vector<1x8x128xbf16>
    %87 = vector.shape_cast %86 : vector<1x8x128xbf16> to vector<8x128xbf16>
    %88 = arith.extf %87 : vector<8x128xbf16> to vector<8x128xf32>
    %89 = vector.extract_strided_slice %88 {offsets = [0, 0], sizes = [8, 64], strides = [1, 1]} : vector<8x128xf32> to vector<8x64xf32>
    %90 = vector.extract_strided_slice %85 {offsets = [0, 0], sizes = [8, 64], strides = [1, 1]} : vector<8x128xf32> to vector<8x64xf32>
    %91 = arith.addf %89, %90 : vector<8x64xf32>
    %92 = arith.negf %91 : vector<8x64xf32>
    %93 = math.exp %92 : vector<8x64xf32>
    %cst_31 = arith.constant 1.000000e+00 : f32
    %94 = vector.broadcast %cst_31 : f32 to vector<8x64xf32>
    %95 = arith.addf %94, %93 : vector<8x64xf32>
    %96 = arith.divf %94, %95 : vector<8x64xf32>
    %97 = vector.extract_strided_slice %96 {offsets = [0, 0], sizes = [8, 32], strides = [1, 1]} : vector<8x64xf32> to vector<8x32xf32>
    %98 = vector.extract_strided_slice %96 {offsets = [0, 32], sizes = [8, 32], strides = [1, 1]} : vector<8x64xf32> to vector<8x32xf32>
    %99 = vector.extract_strided_slice %88 {offsets = [0, 64], sizes = [8, 32], strides = [1, 1]} : vector<8x128xf32> to vector<8x32xf32>
    %100 = vector.extract_strided_slice %85 {offsets = [0, 64], sizes = [8, 32], strides = [1, 1]} : vector<8x128xf32> to vector<8x32xf32>
    %101 = arith.mulf %97, %100 : vector<8x32xf32>
    %102 = arith.addf %99, %101 : vector<8x32xf32>
    %103 = math.tanh %102 : vector<8x32xf32>
    %cst_32 = arith.constant 1.000000e+00 : f32
    %104 = vector.broadcast %cst_32 : f32 to vector<8x32xf32>
    %105 = arith.subf %104, %98 : vector<8x32xf32>
    %106 = arith.mulf %105, %103 : vector<8x32xf32>
    %107 = arith.mulf %98, %82 : vector<8x32xf32>
    %108 = arith.addf %106, %107 : vector<8x32xf32>
    %cst_33 = arith.constant 2.000000e+00 : f32
    %109 = vector.broadcast %cst_33 : f32 to vector<8x32xf32>
    %110 = arith.cmpf ogt, %22, %109 : vector<8x32xf32>
    %111 = arith.select %110, %108, %82 : vector<8x32xi1>, vector<8x32xf32>
    %112 = arith.truncf %111 : vector<8x32xf32> to vector<8x32xbf16>
    %cst_34 = arith.constant dense<0.000000e+00> : vector<8x128xf32>
    %113 = tpu.matmul %112, %23, %cst_34 {dimension_numbers = #tpu.dot_dimension_numbers<[1], [0], [0], [1], [0, 0, 1, 1], [], []>} : vector<8x32xbf16>, vector<32x128xbf16>, vector<8x128xf32> -> vector<8x128xf32>
    %114 = arith.addf %113, %19 : vector<8x128xf32>
    %115 = vector.extract_strided_slice %16 {offsets = [3, 0, 0], sizes = [1, 8, 128], strides = [1, 1, 1]} : vector<8x8x128xbf16> to vector<1x8x128xbf16>
    %116 = vector.shape_cast %115 : vector<1x8x128xbf16> to vector<8x128xbf16>
    %117 = arith.extf %116 : vector<8x128xbf16> to vector<8x128xf32>
    %118 = vector.extract_strided_slice %117 {offsets = [0, 0], sizes = [8, 64], strides = [1, 1]} : vector<8x128xf32> to vector<8x64xf32>
    %119 = vector.extract_strided_slice %114 {offsets = [0, 0], sizes = [8, 64], strides = [1, 1]} : vector<8x128xf32> to vector<8x64xf32>
    %120 = arith.addf %118, %119 : vector<8x64xf32>
    %121 = arith.negf %120 : vector<8x64xf32>
    %122 = math.exp %121 : vector<8x64xf32>
    %cst_35 = arith.constant 1.000000e+00 : f32
    %123 = vector.broadcast %cst_35 : f32 to vector<8x64xf32>
    %124 = arith.addf %123, %122 : vector<8x64xf32>
    %125 = arith.divf %123, %124 : vector<8x64xf32>
    %126 = vector.extract_strided_slice %125 {offsets = [0, 0], sizes = [8, 32], strides = [1, 1]} : vector<8x64xf32> to vector<8x32xf32>
    %127 = vector.extract_strided_slice %125 {offsets = [0, 32], sizes = [8, 32], strides = [1, 1]} : vector<8x64xf32> to vector<8x32xf32>
    %128 = vector.extract_strided_slice %117 {offsets = [0, 64], sizes = [8, 32], strides = [1, 1]} : vector<8x128xf32> to vector<8x32xf32>
    %129 = vector.extract_strided_slice %114 {offsets = [0, 64], sizes = [8, 32], strides = [1, 1]} : vector<8x128xf32> to vector<8x32xf32>
    %130 = arith.mulf %126, %129 : vector<8x32xf32>
    %131 = arith.addf %128, %130 : vector<8x32xf32>
    %132 = math.tanh %131 : vector<8x32xf32>
    %cst_36 = arith.constant 1.000000e+00 : f32
    %133 = vector.broadcast %cst_36 : f32 to vector<8x32xf32>
    %134 = arith.subf %133, %127 : vector<8x32xf32>
    %135 = arith.mulf %134, %132 : vector<8x32xf32>
    %136 = arith.mulf %127, %111 : vector<8x32xf32>
    %137 = arith.addf %135, %136 : vector<8x32xf32>
    %cst_37 = arith.constant 3.000000e+00 : f32
    %138 = vector.broadcast %cst_37 : f32 to vector<8x32xf32>
    %139 = arith.cmpf ogt, %22, %138 : vector<8x32xf32>
    %140 = arith.select %139, %137, %111 : vector<8x32xi1>, vector<8x32xf32>
    %141 = arith.truncf %140 : vector<8x32xf32> to vector<8x32xbf16>
    %cst_38 = arith.constant dense<0.000000e+00> : vector<8x128xf32>
    %142 = tpu.matmul %141, %23, %cst_38 {dimension_numbers = #tpu.dot_dimension_numbers<[1], [0], [0], [1], [0, 0, 1, 1], [], []>} : vector<8x32xbf16>, vector<32x128xbf16>, vector<8x128xf32> -> vector<8x128xf32>
    %143 = arith.addf %142, %19 : vector<8x128xf32>
    %144 = vector.extract_strided_slice %16 {offsets = [4, 0, 0], sizes = [1, 8, 128], strides = [1, 1, 1]} : vector<8x8x128xbf16> to vector<1x8x128xbf16>
    %145 = vector.shape_cast %144 : vector<1x8x128xbf16> to vector<8x128xbf16>
    %146 = arith.extf %145 : vector<8x128xbf16> to vector<8x128xf32>
    %147 = vector.extract_strided_slice %146 {offsets = [0, 0], sizes = [8, 64], strides = [1, 1]} : vector<8x128xf32> to vector<8x64xf32>
    %148 = vector.extract_strided_slice %143 {offsets = [0, 0], sizes = [8, 64], strides = [1, 1]} : vector<8x128xf32> to vector<8x64xf32>
    %149 = arith.addf %147, %148 : vector<8x64xf32>
    %150 = arith.negf %149 : vector<8x64xf32>
    %151 = math.exp %150 : vector<8x64xf32>
    %cst_39 = arith.constant 1.000000e+00 : f32
    %152 = vector.broadcast %cst_39 : f32 to vector<8x64xf32>
    %153 = arith.addf %152, %151 : vector<8x64xf32>
    %154 = arith.divf %152, %153 : vector<8x64xf32>
    %155 = vector.extract_strided_slice %154 {offsets = [0, 0], sizes = [8, 32], strides = [1, 1]} : vector<8x64xf32> to vector<8x32xf32>
    %156 = vector.extract_strided_slice %154 {offsets = [0, 32], sizes = [8, 32], strides = [1, 1]} : vector<8x64xf32> to vector<8x32xf32>
    %157 = vector.extract_strided_slice %146 {offsets = [0, 64], sizes = [8, 32], strides = [1, 1]} : vector<8x128xf32> to vector<8x32xf32>
    %158 = vector.extract_strided_slice %143 {offsets = [0, 64], sizes = [8, 32], strides = [1, 1]} : vector<8x128xf32> to vector<8x32xf32>
    %159 = arith.mulf %155, %158 : vector<8x32xf32>
    %160 = arith.addf %157, %159 : vector<8x32xf32>
    %161 = math.tanh %160 : vector<8x32xf32>
    %cst_40 = arith.constant 1.000000e+00 : f32
    %162 = vector.broadcast %cst_40 : f32 to vector<8x32xf32>
    %163 = arith.subf %162, %156 : vector<8x32xf32>
    %164 = arith.mulf %163, %161 : vector<8x32xf32>
    %165 = arith.mulf %156, %140 : vector<8x32xf32>
    %166 = arith.addf %164, %165 : vector<8x32xf32>
    %cst_41 = arith.constant 4.000000e+00 : f32
    %167 = vector.broadcast %cst_41 : f32 to vector<8x32xf32>
    %168 = arith.cmpf ogt, %22, %167 : vector<8x32xf32>
    %169 = arith.select %168, %166, %140 : vector<8x32xi1>, vector<8x32xf32>
    %170 = arith.truncf %169 : vector<8x32xf32> to vector<8x32xbf16>
    %cst_42 = arith.constant dense<0.000000e+00> : vector<8x128xf32>
    %171 = tpu.matmul %170, %23, %cst_42 {dimension_numbers = #tpu.dot_dimension_numbers<[1], [0], [0], [1], [0, 0, 1, 1], [], []>} : vector<8x32xbf16>, vector<32x128xbf16>, vector<8x128xf32> -> vector<8x128xf32>
    %172 = arith.addf %171, %19 : vector<8x128xf32>
    %173 = vector.extract_strided_slice %16 {offsets = [5, 0, 0], sizes = [1, 8, 128], strides = [1, 1, 1]} : vector<8x8x128xbf16> to vector<1x8x128xbf16>
    %174 = vector.shape_cast %173 : vector<1x8x128xbf16> to vector<8x128xbf16>
    %175 = arith.extf %174 : vector<8x128xbf16> to vector<8x128xf32>
    %176 = vector.extract_strided_slice %175 {offsets = [0, 0], sizes = [8, 64], strides = [1, 1]} : vector<8x128xf32> to vector<8x64xf32>
    %177 = vector.extract_strided_slice %172 {offsets = [0, 0], sizes = [8, 64], strides = [1, 1]} : vector<8x128xf32> to vector<8x64xf32>
    %178 = arith.addf %176, %177 : vector<8x64xf32>
    %179 = arith.negf %178 : vector<8x64xf32>
    %180 = math.exp %179 : vector<8x64xf32>
    %cst_43 = arith.constant 1.000000e+00 : f32
    %181 = vector.broadcast %cst_43 : f32 to vector<8x64xf32>
    %182 = arith.addf %181, %180 : vector<8x64xf32>
    %183 = arith.divf %181, %182 : vector<8x64xf32>
    %184 = vector.extract_strided_slice %183 {offsets = [0, 0], sizes = [8, 32], strides = [1, 1]} : vector<8x64xf32> to vector<8x32xf32>
    %185 = vector.extract_strided_slice %183 {offsets = [0, 32], sizes = [8, 32], strides = [1, 1]} : vector<8x64xf32> to vector<8x32xf32>
    %186 = vector.extract_strided_slice %175 {offsets = [0, 64], sizes = [8, 32], strides = [1, 1]} : vector<8x128xf32> to vector<8x32xf32>
    %187 = vector.extract_strided_slice %172 {offsets = [0, 64], sizes = [8, 32], strides = [1, 1]} : vector<8x128xf32> to vector<8x32xf32>
    %188 = arith.mulf %184, %187 : vector<8x32xf32>
    %189 = arith.addf %186, %188 : vector<8x32xf32>
    %190 = math.tanh %189 : vector<8x32xf32>
    %cst_44 = arith.constant 1.000000e+00 : f32
    %191 = vector.broadcast %cst_44 : f32 to vector<8x32xf32>
    %192 = arith.subf %191, %185 : vector<8x32xf32>
    %193 = arith.mulf %192, %190 : vector<8x32xf32>
    %194 = arith.mulf %185, %169 : vector<8x32xf32>
    %195 = arith.addf %193, %194 : vector<8x32xf32>
    %cst_45 = arith.constant 5.000000e+00 : f32
    %196 = vector.broadcast %cst_45 : f32 to vector<8x32xf32>
    %197 = arith.cmpf ogt, %22, %196 : vector<8x32xf32>
    %198 = arith.select %197, %195, %169 : vector<8x32xi1>, vector<8x32xf32>
    %199 = arith.truncf %198 : vector<8x32xf32> to vector<8x32xbf16>
    %cst_46 = arith.constant dense<0.000000e+00> : vector<8x128xf32>
    %200 = tpu.matmul %199, %23, %cst_46 {dimension_numbers = #tpu.dot_dimension_numbers<[1], [0], [0], [1], [0, 0, 1, 1], [], []>} : vector<8x32xbf16>, vector<32x128xbf16>, vector<8x128xf32> -> vector<8x128xf32>
    %201 = arith.addf %200, %19 : vector<8x128xf32>
    %202 = vector.extract_strided_slice %16 {offsets = [6, 0, 0], sizes = [1, 8, 128], strides = [1, 1, 1]} : vector<8x8x128xbf16> to vector<1x8x128xbf16>
    %203 = vector.shape_cast %202 : vector<1x8x128xbf16> to vector<8x128xbf16>
    %204 = arith.extf %203 : vector<8x128xbf16> to vector<8x128xf32>
    %205 = vector.extract_strided_slice %204 {offsets = [0, 0], sizes = [8, 64], strides = [1, 1]} : vector<8x128xf32> to vector<8x64xf32>
    %206 = vector.extract_strided_slice %201 {offsets = [0, 0], sizes = [8, 64], strides = [1, 1]} : vector<8x128xf32> to vector<8x64xf32>
    %207 = arith.addf %205, %206 : vector<8x64xf32>
    %208 = arith.negf %207 : vector<8x64xf32>
    %209 = math.exp %208 : vector<8x64xf32>
    %cst_47 = arith.constant 1.000000e+00 : f32
    %210 = vector.broadcast %cst_47 : f32 to vector<8x64xf32>
    %211 = arith.addf %210, %209 : vector<8x64xf32>
    %212 = arith.divf %210, %211 : vector<8x64xf32>
    %213 = vector.extract_strided_slice %212 {offsets = [0, 0], sizes = [8, 32], strides = [1, 1]} : vector<8x64xf32> to vector<8x32xf32>
    %214 = vector.extract_strided_slice %212 {offsets = [0, 32], sizes = [8, 32], strides = [1, 1]} : vector<8x64xf32> to vector<8x32xf32>
    %215 = vector.extract_strided_slice %204 {offsets = [0, 64], sizes = [8, 32], strides = [1, 1]} : vector<8x128xf32> to vector<8x32xf32>
    %216 = vector.extract_strided_slice %201 {offsets = [0, 64], sizes = [8, 32], strides = [1, 1]} : vector<8x128xf32> to vector<8x32xf32>
    %217 = arith.mulf %213, %216 : vector<8x32xf32>
    %218 = arith.addf %215, %217 : vector<8x32xf32>
    %219 = math.tanh %218 : vector<8x32xf32>
    %cst_48 = arith.constant 1.000000e+00 : f32
    %220 = vector.broadcast %cst_48 : f32 to vector<8x32xf32>
    %221 = arith.subf %220, %214 : vector<8x32xf32>
    %222 = arith.mulf %221, %219 : vector<8x32xf32>
    %223 = arith.mulf %214, %198 : vector<8x32xf32>
    %224 = arith.addf %222, %223 : vector<8x32xf32>
    %cst_49 = arith.constant 6.000000e+00 : f32
    %225 = vector.broadcast %cst_49 : f32 to vector<8x32xf32>
    %226 = arith.cmpf ogt, %22, %225 : vector<8x32xf32>
    %227 = arith.select %226, %224, %198 : vector<8x32xi1>, vector<8x32xf32>
    %228 = arith.truncf %227 : vector<8x32xf32> to vector<8x32xbf16>
    %cst_50 = arith.constant dense<0.000000e+00> : vector<8x128xf32>
    %229 = tpu.matmul %228, %23, %cst_50 {dimension_numbers = #tpu.dot_dimension_numbers<[1], [0], [0], [1], [0, 0, 1, 1], [], []>} : vector<8x32xbf16>, vector<32x128xbf16>, vector<8x128xf32> -> vector<8x128xf32>
    %230 = arith.addf %229, %19 : vector<8x128xf32>
    %231 = vector.extract_strided_slice %16 {offsets = [7, 0, 0], sizes = [1, 8, 128], strides = [1, 1, 1]} : vector<8x8x128xbf16> to vector<1x8x128xbf16>
    %232 = vector.shape_cast %231 : vector<1x8x128xbf16> to vector<8x128xbf16>
    %233 = arith.extf %232 : vector<8x128xbf16> to vector<8x128xf32>
    %234 = vector.extract_strided_slice %233 {offsets = [0, 0], sizes = [8, 64], strides = [1, 1]} : vector<8x128xf32> to vector<8x64xf32>
    %235 = vector.extract_strided_slice %230 {offsets = [0, 0], sizes = [8, 64], strides = [1, 1]} : vector<8x128xf32> to vector<8x64xf32>
    %236 = arith.addf %234, %235 : vector<8x64xf32>
    %237 = arith.negf %236 : vector<8x64xf32>
    %238 = math.exp %237 : vector<8x64xf32>
    %cst_51 = arith.constant 1.000000e+00 : f32
    %239 = vector.broadcast %cst_51 : f32 to vector<8x64xf32>
    %240 = arith.addf %239, %238 : vector<8x64xf32>
    %241 = arith.divf %239, %240 : vector<8x64xf32>
    %242 = vector.extract_strided_slice %241 {offsets = [0, 0], sizes = [8, 32], strides = [1, 1]} : vector<8x64xf32> to vector<8x32xf32>
    %243 = vector.extract_strided_slice %241 {offsets = [0, 32], sizes = [8, 32], strides = [1, 1]} : vector<8x64xf32> to vector<8x32xf32>
    %244 = vector.extract_strided_slice %233 {offsets = [0, 64], sizes = [8, 32], strides = [1, 1]} : vector<8x128xf32> to vector<8x32xf32>
    %245 = vector.extract_strided_slice %230 {offsets = [0, 64], sizes = [8, 32], strides = [1, 1]} : vector<8x128xf32> to vector<8x32xf32>
    %246 = arith.mulf %242, %245 : vector<8x32xf32>
    %247 = arith.addf %244, %246 : vector<8x32xf32>
    %248 = math.tanh %247 : vector<8x32xf32>
    %cst_52 = arith.constant 1.000000e+00 : f32
    %249 = vector.broadcast %cst_52 : f32 to vector<8x32xf32>
    %250 = arith.subf %249, %243 : vector<8x32xf32>
    %251 = arith.mulf %250, %248 : vector<8x32xf32>
    %252 = arith.mulf %243, %227 : vector<8x32xf32>
    %253 = arith.addf %251, %252 : vector<8x32xf32>
    %cst_53 = arith.constant 7.000000e+00 : f32
    %254 = vector.broadcast %cst_53 : f32 to vector<8x32xf32>
    %255 = arith.cmpf ogt, %22, %254 : vector<8x32xf32>
    %256 = arith.select %255, %253, %227 : vector<8x32xi1>, vector<8x32xf32>
    %257 = arith.truncf %256 : vector<8x32xf32> to vector<8x32xbf16>
    %c0_54 = arith.constant 0 : index
    %c0_55 = arith.constant 0 : index
    %258 = vector.load %arg7[%c0_54, %c0_55] : memref<32x128xbf16, #tpu.memory_space<vmem>>, vector<32x128xbf16>
    %cst_56 = arith.constant dense<0.000000e+00> : vector<8x128xf32>
    %259 = tpu.matmul %257, %258, %cst_56 {dimension_numbers = #tpu.dot_dimension_numbers<[1], [0], [0], [1], [0, 0, 1, 1], [], []>} : vector<8x32xbf16>, vector<32x128xbf16>, vector<8x128xf32> -> vector<8x128xf32>
    %c0_57 = arith.constant 0 : index
    %c0_58 = arith.constant 0 : index
    %260 = vector.load %arg8[%c0_57, %c0_58] : memref<1x128xf32, #tpu.memory_space<vmem>>, vector<1x128xf32>
    %261 = vector.broadcast %260 : vector<1x128xf32> to vector<8x128xf32>
    %262 = arith.addf %259, %261 : vector<8x128xf32>
    %263 = math.tanh %262 : vector<8x128xf32>
    %c0_59 = arith.constant 0 : index
    %c0_60 = arith.constant 0 : index
    %264 = vector.load %arg12[%c0_59, %c0_60] : memref<8x128xf32, #tpu.memory_space<vmem>>, vector<8x128xf32>
    tpu.vector_store %arg12[%c0_59, %c0_60], %263 {strides = array<i32>} : memref<8x128xf32, #tpu.memory_space<vmem>>, vector<8x128xf32>,
    return
  }
  func.func @transform_0(%arg0: i32) -> (i32, i32, i32) {
    %c0_i32 = arith.constant 0 : i32
    %c0_i32_0 = arith.constant 0 : i32
    %c0_i32_1 = arith.constant 0 : i32
    return %c0_i32, %arg0, %c0_i32_0 : i32, i32, i32
  }
  func.func @transform_1(%arg0: i32) -> (i32, i32) {
    %c0_i32 = arith.constant 0 : i32
    %c0_i32_0 = arith.constant 0 : i32
    return %arg0, %c0_i32 : i32, i32
  }
  func.func @transform_2(%arg0: i32) -> (i32, i32) {
    %c0_i32 = arith.constant 0 : i32
    %c0_i32_0 = arith.constant 0 : i32
    %c0_i32_1 = arith.constant 0 : i32
    return %c0_i32, %c0_i32_0 : i32, i32
  }
  func.func @transform_3(%arg0: i32) -> (i32, i32) {
    %c0_i32 = arith.constant 0 : i32
    %c0_i32_0 = arith.constant 0 : i32
    %c0_i32_1 = arith.constant 0 : i32
    return %c0_i32, %c0_i32_0 : i32, i32
  }
  func.func @transform_4(%arg0: i32) -> (i32, i32) {
    %c0_i32 = arith.constant 0 : i32
    %c0_i32_0 = arith.constant 0 : i32
    %c0_i32_1 = arith.constant 0 : i32
    return %c0_i32, %c0_i32_0 : i32, i32
  }
  func.func @transform_5(%arg0: i32) -> (i32, i32) {
    %c0_i32 = arith.constant 0 : i32
    %c0_i32_0 = arith.constant 0 : i32
    %c0_i32_1 = arith.constant 0 : i32
    return %c0_i32, %c0_i32_0 : i32, i32
  }
  func.func @transform_6(%arg0: i32) -> (i32, i32) {
    %c0_i32 = arith.constant 0 : i32
    %c0_i32_0 = arith.constant 0 : i32
    %c0_i32_1 = arith.constant 0 : i32
    return %c0_i32, %c0_i32_0 : i32, i32
  }
  func.func @transform_7(%arg0: i32) -> (i32, i32) {
    %c0_i32 = arith.constant 0 : i32
    %c0_i32_0 = arith.constant 0 : i32
    %c0_i32_1 = arith.constant 0 : i32
    return %c0_i32, %c0_i32_0 : i32, i32
  }
  func.func @transform_8(%arg0: i32) -> (i32, i32) {
    %c0_i32 = arith.constant 0 : i32
    %c0_i32_0 = arith.constant 0 : i32
    return %arg0, %c0_i32 : i32, i32
  }
  func.func @transform_9(%arg0: i32) -> (i32, i32) {
    %c0_i32 = arith.constant 0 : i32
    %c0_i32_0 = arith.constant 0 : i32
    %c0_i32_1 = arith.constant 0 : i32
    return %c0_i32, %c0_i32_0 : i32, i32
  }
  func.func @transform_10(%arg0: i32) -> (i32, i32) {
    %c0_i32 = arith.constant 0 : i32
    %c0_i32_0 = arith.constant 0 : i32
    %c0_i32_1 = arith.constant 0 : i32
    return %c0_i32, %c0_i32_0 : i32, i32
  }
  func.func @transform_11(%arg0: i32) -> (i32, i32) {
    %c0_i32 = arith.constant 0 : i32
    %c0_i32_0 = arith.constant 0 : i32
    return %arg0, %c0_i32 : i32, i32
  }
  func.func @transform_12(%arg0: i32) -> (i32, i32) {
    %c0_i32 = arith.constant 0 : i32
    %c0_i32_0 = arith.constant 0 : i32
    return %arg0, %c0_i32 : i32, i32
  }
}

</mosaic_0001>

<bundles_post_ra>
// kernel: tpu_custom_call.1
= control target key start
LH: loop header
LB: loop body
LE: loop exit
PB: predicated region body
PF: predicated region fallthrough
CT: control target
= control target key end

     0   :  { %18 = vsyncpa [#allocation3], 0  ;;  %s1814_s0 = inlined_call_operand.hbm [shape: bf16[8,8,32], index: 0, kind: input, shape index: {}]   ;;  %s1815_s1 = inlined_call_operand.vmem [shape: f32[8,1], index: 1, kind: input, shape index: {}]   ;;  %s1816_s2 = inlined_call_operand.hbm [shape: bf16[32,128], index: 2, kind: input, shape index: {}]   ;;  %s1817_s3 = inlined_call_operand.hbm [shape: bf16[32,128], index: 3, kind: input, shape index: {}]   ;;  %s1818_s4 = inlined_call_operand.vmem [shape: f32[1,128], index: 4, kind: input, shape index: {}]   ;;  %s1819_s5 = inlined_call_operand.vmem [shape: f32[1,128], index: 5, kind: input, shape index: {}]   ;;  %s1820_s6 = inlined_call_operand.hbm [shape: bf16[32,128], index: 6, kind: input, shape index: {}]   ;;  %s1821_s7 = inlined_call_operand.vmem [shape: f32[1,128], index: 7, kind: input, shape index: {}]   ;;  %s1822_s8 = inlined_call_operand.vmem [shape: bf16[8,64], index: 8, kind: input, shape index: {}]   ;;  %s1823_s9 = inlined_call_operand.vmem [shape: bf16[64,128], index: 9, kind: input, shape index: {}]   ;;  %s1824_s10 = inlined_call_operand.vmem [shape: f32[1,128], index: 10, kind: input, shape index: {}]   ;;  %s1825_s11 = inlined_call_operand.hbm [shape: f32[8,128], index: 11, kind: output, shape index: {0}]   ;;  %s1826_s12 = inlined_call_operand.hbm [shape: f32[8,128], index: 12, kind: output, shape index: {1}]  }
   0x1   :  { %19 = vsyncpa [#allocation6], 0 }
   0x2   :  { %20 = vsyncpa [#allocation9], 0 }
   0x3   :  { %21 = vsyncpa [#allocation4], 0 }
   0x4   :  { %22 = vsyncpa [#allocation12], 0  ;;  %s1452_s21 = smov [#allocation5]   ;;  %s1453_s23 = smov [#allocation2]  }
   0x5   :  { %s42_s22 = sshll.u32 %s1452_s21, 4  ;;  %s28_s24 = sshll.u32 %s1453_s23, 4  ;;  %s43_s22 = int_to_ptr.vmem [resolvable:$true] %s42_s22  ;;  %s1529_s24 = int_to_ptr.vmem [resolvable:$true] %s28_s24 }
   0x6   :  { %s1310_s27 = scalar_lea.hbm %s1816_s2, 256 }
   0x7   :  { %p1311_p0 = scmp.ne.s32.totalorder %s1816_s2, %s1310_s27  ;;  %p1314_p1 = scmp.lt.u32.totalorder %s1310_s27, %s1816_s2 }
   0x9   :  { %p1316_p2 = pnand %p1314_p1, %p1311_p0 }
   0xb   :  { %1319 = shalt.err (!%p1316_p2)
}
   0xc   :  { %s1320_s14 = scalar_lea.vmem %s43_s22, 256  ;;  %p1325_p4 = scmp.lt.s32.totalorder %s43_s22, %s43_s22 }
   0xd   :  { %p1321_p3 = scmp.ne.s32.totalorder %s43_s22, %s1320_s14  ;;  %p1326_p5 = scmp.lt.s32.totalorder %s1320_s14, %s1320_s14 }
   0xf   :  { %p1327_p6 = por %p1326_p5, %p1325_p4 }
  0x11   :  { %p1328_p7 = pnand %p1327_p6, %p1321_p3 }
  0x13   :  { %1331 = shalt.err (!%p1328_p7)
}
  0x14   :  { %s1454_s15 = smov 64   ;;  %s1455_s16 = smov 4  }
  0x15   :  { %48 = dma.hbm_to_vmem [thread:$0]  %s1816_s2, 256, %s43_s22, [#allocation6], %s1454_s15, %s1454_s15, %s1455_s16  }
  0x16   :  { %s1332_s21 = scalar_lea.hbm %s1814_s0, 512 }
  0x17   :  { %p1333_p8 = scmp.ne.s32.totalorder %s1814_s0, %s1332_s21  ;;  %p1336_p9 = scmp.lt.u32.totalorder %s1332_s21, %s1814_s0 }
  0x19   :  { %p1338_p10 = pnand %p1336_p9, %p1333_p8 }
  0x1b   :  { %1341 = shalt.err (!%p1338_p10)
}
  0x1c   :  { %s1342_s28 = scalar_lea.vmem %s1529_s24, 512  ;;  %p1347_p12 = scmp.lt.s32.totalorder %s1529_s24, %s1529_s24 }
  0x1d   :  { %p1343_p11 = scmp.ne.s32.totalorder %s1529_s24, %s1342_s28  ;;  %p1348_p13 = scmp.lt.s32.totalorder %s1342_s28, %s1342_s28 }
  0x1f   :  { %p1349_p0 = por %p1348_p13, %p1347_p12 }
  0x21   :  { %p1350_p1 = pnand %p1349_p0, %p1343_p11 }
  0x23   :  { %1353 = shalt.err (!%p1350_p1)
}
  0x24   :  { %34 = dma.hbm_to_vmem [thread:$0]  %s1814_s0, 512, %s1529_s24, [#allocation3], %s1454_s15, %s1454_s15, %s1455_s16  }
  0x25   :  { %s1456_s29 = smov [#allocation7]   ;;  %s1457_s13 = smov [#allocation8]  }
  0x26   :  { %s54_s30 = sshll.u32 %s1456_s29, 4  ;;  %s70_s14 = sshll.u32 %s1457_s13, 4  ;;  %s55_s30 = int_to_ptr.vmem [resolvable:$true] %s54_s30  ;;  %s1566_s14 = int_to_ptr.vmem [resolvable:$true] %s70_s14 }
  0x27   :  { %s1354_s19 = scalar_lea.hbm %s1817_s3, 256 }
  0x28   :  { %p1355_p2 = scmp.ne.s32.totalorder %s1817_s3, %s1354_s19  ;;  %p1358_p3 = scmp.lt.u32.totalorder %s1354_s19, %s1817_s3 }
  0x2a   :  { %p1360_p4 = pnand %p1358_p3, %p1355_p2 }
  0x2c   :  { %1363 = shalt.err (!%p1360_p4)
}
  0x2d   :  { %s1364_s0 = scalar_lea.vmem %s55_s30, 256  ;;  %p1369_p6 = scmp.lt.s32.totalorder %s55_s30, %s55_s30 }
  0x2e   :  { %p1365_p5 = scmp.ne.s32.totalorder %s55_s30, %s1364_s0  ;;  %p1370_p7 = scmp.lt.s32.totalorder %s1364_s0, %s1364_s0 }
  0x30   :  { %p1371_p8 = por %p1370_p7, %p1369_p6 }
  0x32   :  { %p1372_p9 = pnand %p1371_p8, %p1365_p5 }
  0x34   :  { %1375 = shalt.err (!%p1372_p9)
}
  0x35   :  { %60 = dma.hbm_to_vmem [thread:$0]  %s1817_s3, 256, %s55_s30, [#allocation6], %s1454_s15, %s1454_s15, %s1455_s16  }
  0x36   :  { %s1376_s2 = scalar_lea.hbm %s1820_s6, 256 }
  0x37   :  { %p1377_p10 = scmp.ne.s32.totalorder %s1820_s6, %s1376_s2  ;;  %p1380_p11 = scmp.lt.u32.totalorder %s1376_s2, %s1820_s6 }
  0x39   :  { %p1382_p12 = pnand %p1380_p11, %p1377_p10 }
  0x3b   :  { %1385 = shalt.err (!%p1382_p12)
}
  0x3c   :  { %s1386_s18 = scalar_lea.vmem %s1566_s14, 256  ;;  %p1391_p0 = scmp.lt.s32.totalorder %s1566_s14, %s1566_s14 }
  0x3d   :  { %p1387_p13 = scmp.ne.s32.totalorder %s1566_s14, %s1386_s18  ;;  %p1392_p1 = scmp.lt.s32.totalorder %s1386_s18, %s1386_s18 }
  0x3f   :  { %p1393_p2 = por %p1392_p1, %p1391_p0 }
  0x41   :  { %p1394_p3 = pnand %p1393_p2, %p1387_p13 }
  0x43   :  { %1397 = shalt.err (!%p1394_p3)
}
  0x44   :  { %76 = dma.hbm_to_vmem [thread:$0]  %s1820_s6, 256, %s1566_s14, [#allocation9], %s1454_s15, %s1454_s15, %s1455_s16  }
  0x45   :  { %1442 = dma.done.wait [#allocation3], 512  }
  0x46   :  { %1443 = vsyncadd [#allocation3], 4294966784 }
  0x47   :  { %1444 = dma.done.wait [#allocation6], 512  }
  0x48   :  { %1445 = vsyncadd [#allocation6], 4294966784 }
  0x49   :  { %1446 = dma.done.wait [#allocation9], 256  }
  0x4a   :  { %1447 = vsyncadd [#allocation9], 4294967040  ;;  %v1458_v0 = vmov 0.0   ;;  %vm1459_vm0 = vmmov 0   ;;  %v1460_v1 = vmov 0   ;;  %v1244_v2 = vld [vmem:[%s1823_s9] sm:$0xff]  }
  0x4b   :  { %1134 = vmatprep.subr.bf16.mxu0 %v1458_v0  ;;  %1142 = vmatprep.mubr.msk.bf16.mxu0 %vm1459_vm0, %v1458_v0  ;;  %v1245_v3 = vld [vmem:[%s1823_s9 + $0x8] sm:$0xff]   ;;  %v1247_v4 = vld [vmem:[#allocation5] sm:$0xff]   ;;  %v1246_v5 = vld [vmem:[%s1823_s9 + $0x10] sm:$0xff]   ;;  %vm235_vm1 = vcmask 261120   ;;  %vm138_vm2 = vcmask 523264  }
  0x4c   :  { %1242 = vset.pattern.permute.xlu1 %v1460_v1  ;;  %1243 = vset.pattern.permute.xlu0 %v1460_v1  ;;  %v1249_v6 = vld [vmem:[#allocation5 + $0x8] sm:$0xff]   ;;  %v1251_v7 = vld [vmem:[#allocation2] sm:$0xff]   ;;  %v1248_v9 = vld [vmem:[%s1823_s9 + $0x18] sm:$0xff]  }
  0x4d   :  { %1135 = vmatpush3.bf16.msra.mxu0 %v1244_v2  ;;  %1146 = vmatprep.subr.bf16.mxu1 %v1247_v4  ;;  %v1252_v8 = vld [vmem:[#allocation2 + $0x8] sm:$0xff]   ;;  %v1620_v10 = vld [vmem:[#allocation7] sm:$0xff]   ;;  %v98_v11 = vld [vmem:[%s1822_s8] sm:$0xf] }
  0x4e   :  { %1136 = vmatprep.subr.bf16.mxu0 %v1458_v0  ;;  %1147 = vmatpush3.bf16.msra.mxu1 %v1247_v4  ;;  %v1632_v12 = vld [vmem:[#allocation7 + $0x8] sm:$0xff]   ;;  %v1057_v15 = vld [vmem:[%s1824_s10] ss:$0 sm:$0xff]  ;;  %v1254_v44 = vld [vmem:[#allocation2 + $0x10] sm:$0xff]  }
  0x4f   :  { %1148 = vmatprep.subr.bf16.mxu1 %v1249_v6  ;;  %1150 = vmatprep.mubr.msk.bf16.mxu1 %vm235_vm1, %v1251_v7  ;;  %v328_v19 = vld [vmem:[%s1815_s1] sm:$0xff]  ;;  %v1255_v45 = vld [vmem:[#allocation2 + $0x18] sm:$0xff]  }
  0x50   :  { %331 = vperm.xlu1 %1242, %v328_v19   ;;  %v1663_v24 = vld [vmem:[%s1819_s5] ss:$0 sm:$0xff]  ;;  %s1462_s5 = smov [#allocation11]  }
  0x51   :  { %1137 = vmatpush3.bf16.msra.mxu0 %v1245_v3  ;;  %v1670_v31 = vld [vmem:[%s1818_s4] ss:$0 sm:$0xff]  ;;  %s1461_s4 = smov 96  }
  0x52   :  { %1138 = vmatprep.subr.bf16.mxu0 %v1458_v0  ;;  %1149 = vmatpush3.bf16.msra.mxu1 %v1249_v6 }
  0x53   :  { %1166 = vmatprep.subr.bf16.mxu1 %v1458_v0 }
  0x55   :  { %1139 = vmatpush3.bf16.msra.mxu0 %v1246_v5  ;;  %1151 = vmatmul.mubr.msk.bf16.vlgmr.msra.gmra.mrb[0].mxu1 %vm235_vm1, %v1252_v8 }
  0x56   :  { %1140 = vmatprep.subr.bf16.mxu0 %v1458_v0  ;;  %1167 = vmatpush3.bf16.msra.mxu1 %v1620_v10 }
  0x57   :  { %1168 = vmatprep.subr.bf16.mxu1 %v1458_v0  ;;  %1154 = vmatprep.mubr.msk.bf16.mxu1 %vm235_vm1, %v1254_v44 }
  0x59   :  { %1141 = vmatpush3.bf16.msra.mxu0 %v1248_v9 }
  0x5a   :  { %1158 = vmatprep.subr.bf16.mxu0 %v1458_v0  ;;  %1169 = vmatpush3.bf16.msra.mxu1 %v1632_v12 }
  0x5b   :  { %1182 = vmatprep.subr.bf16.mxu1 %v1458_v0 }
  0x5c   :  { %1143 = vmatmul.mubr.msk.bf16.vlgmr.msra.gmra.mrb[0].mxu0 %vm138_vm2, %v98_v11 }
  0x5d   :  { %1159 = vmatpush3.bf16.msra.mxu0 %v1620_v10  ;;  %1162 = vmatprep.mubr.msk.bf16.mxu0 %vm1459_vm0, %v1458_v0 }
  0x5e   :  { %1160 = vmatprep.subr.bf16.mxu0 %v1458_v0  ;;  %1155 = vmatmul.mubr.msk.bf16.gmra.mrb[4].mxu1 %vm235_vm1, %v1255_v45 }
  0x5f   :  { %1170 = vmatprep.mubr.msk.bf16.mxu1 %vm1459_vm0, %v1458_v0 }
  0x61   :  { %1161 = vmatpush3.bf16.msra.mxu0 %v1632_v12 }
  0x62   :  { %1174 = vmatprep.subr.bf16.mxu0 %v1458_v0 }
  0x64   :  { %1163 = vmatmul.mubr.bf16.vlgmr.msra.gmra.mrb[4].mxu0 %v1460_v1 }
  0x65   :  { %1175 = vmatpush3.bf16.msra.mxu0 %v1620_v10  ;;  %1178 = vmatprep.mubr.msk.bf16.mxu0 %vm1459_vm0, %v1458_v0 }
  0x66   :  { %1176 = vmatprep.subr.bf16.mxu0 %v1458_v0 }
  0x69   :  { %1177 = vmatpush3.bf16.msra.mxu0 %v1632_v12 }
  0x6a   :  { %1190 = vmatprep.subr.bf16.mxu0 %v1458_v0 }
  0xcf   :  { %v1679_v47 = vpop.permute.xlu1 %331 }
  0xd0   :  { %vm420_vm3 = vcmp.gt.f32.partialorder %v1679_v47, 0.0  ;;  %vm496_vm4 = vcmp.gt.f32.partialorder %v1679_v47, 1.0  ;;  %vm572_vm5 = vcmp.gt.f32.partialorder %v1679_v47, 2.0  ;;  %vm648_vm6 = vcmp.gt.f32.partialorder %v1679_v47, 3.0 }
  0xd1   :  { %vm724_vm7 = vcmp.gt.f32.partialorder %v1679_v47, 4.0  ;;  %vm800_vm8 = vcmp.gt.f32.partialorder %v1679_v47, 5.0  ;;  %vm876_vm9 = vcmp.gt.f32.partialorder %v1679_v47, 6.0  ;;  %vm952_vm10 = vcmp.gt.f32.partialorder %v1679_v47, 7.0 }
 0x128   :  { %v1648_v13 = vpop.f32.mrb[0].mxu1 }
 0x129   :  { %v282_v14 = vpop.f32.mrb[1].mxu1 }
 0x12a   :  { %v1653_v16 = vpop.f32.mrb[2].mxu1  ;;  %v283_v32 = vadd.f32 %v1670_v31, %v282_v14 }
 0x12b   :  { %v1655_v17 = vpop.f32.mrb[3].mxu1 }
 0x12c   :  { %v313_v33 = vpack.c.bf16 %v283_v32, %v283_v32  ;;  %v286_v2 = vadd.f32 %v1670_v31, %v1655_v17 }
 0x12e   :  { %v393_v34 = vunpack.c.l.bf16 %v313_v33  ;;  %v314_v3 = vpack.c.bf16 %v286_v2, %v286_v2 }
 0x12f   :  { %v176_v18 = vpop.f32.mrb[0].mxu0 }
 0x130   :  { %v177_v20 = vadd.f32 %v1057_v15, %v176_v18  ;;  %v1144_v21 = vpop.f32.mrb[1].mxu0  ;;  %v469_v4 = vunpack.c.l.bf16 %v314_v3 }
 0x131   :  { %v179_v22 = vpop.f32.mrb[2].mxu0  ;;  %v1683_v55 = vpop.f32.mrb[4].mxu1 }
 0x132   :  { %1258 = vtanh.f32 %v177_v20  ;;  %v1145_v23 = vpop.f32.mrb[3].mxu0  ;;  %v1685_v56 = vpop.f32.mrb[5].mxu1 }
 0x133   :  { %v1687_v57 = vpop.f32.mrb[6].mxu1 }
 0x134   :  { %v1689_v58 = vpop.f32.mrb[7].mxu1 }
 0x137   :  { %v387_v25 = vpop.f32.mrb[4].mxu0 }
 0x138   :  { %v388_v26 = vadd.f32 %v1663_v24, %v387_v25  ;;  %v1164_v27 = vpop.f32.mrb[5].mxu0 }
 0x139   :  { %v390_v28 = vpop.f32.mrb[6].mxu0 }
 0x13a   :  { %402 = vrot.lane.b32.xlu0 %v388_v26, %s1454_s15  ;;  %v1165_v29 = vpop.f32.mrb[7].mxu0  ;;  %v394_v35 = vadd.f32 %v393_v34, %v388_v26 }
 0x13c   :  { %v1259_v30 = vpop.eup %1258  ;;  %v1077_v36 = vmul.f32 -1.442695, %v394_v35 }
 0x13d   :  { %183 = vst [vmem:[#allocation11] sm:$0xff] %v1259_v30 }
 0x13e   :  { %1260 = vpow2.f32 %v1077_v36 }
 0x148   :  { %v1261_v37 = vpop.eup %1260 }
 0x149   :  { %v398_v38 = vadd.f32 1.0, %v1261_v37 }
 0x14b   :  { %1262 = vrcp.f32 %v398_v38 }
 0x155   :  { %v1263_v39 = vpop.eup %1262 }
 0x156   :  { %v412_v48 = vsub.f32 1.0, %v1263_v39  ;;  %v418_v50 = vmul.f32 0.0, %v1263_v39 }
 0x1ac   :  { %v403_v40 = vpop.permute.xlu0 %402 }
 0x1ad   :  { %v405_v41 = vmul.f32 %v1263_v39, %v403_v40 }
 0x1af   :  { %407 = vrot.lane.b32.xlu0 %v405_v41, %s1454_s15 }
 0x221   :  { %v408_v42 = vpop.permute.xlu0 %407 }
 0x222   :  { %v410_v43 = vadd.f32 %v408_v42, %v393_v34  ;;  %v291_v34 = vadd.f32 %v1648_v13, %v1670_v31 }
 0x224   :  { %1264 = vtanh.f32 %v410_v43  ;;  %v315_v35 = vpack.c.bf16 %v291_v34, %v291_v34 }
 0x226   :  { %v545_v36 = vunpack.c.l.bf16 %v315_v35 }
 0x22e   :  { %v1265_v46 = vpop.eup %1264 }
 0x22f   :  { %414 = vrot.lane.b32.xlu1 %v1265_v46, %s1461_s4 }
 0x2a1   :  { %v415_v49 = vpop.permute.xlu1 %414 }
 0x2a2   :  { %v417_v51 = vmul.f32 %v415_v49, %v412_v48 }
 0x2a4   :  { %v419_v52 = vadd.f32 %v418_v50, %v417_v51 }
 0x2a6   :  { %v421_v53 = vsel %vm420_vm3, %v419_v52, 0.0 }
 0x2a7   :  { %v422_v54 = vpack.c.bf16 %v421_v53, %v421_v53 }
 0x2a9   :  { %424 = vrot.lane.b32.xlu0 %v422_v54, %s1461_s4 }
 0x31b   :  { %v425_v59 = vpop.permute.xlu0 %424 }
 0x31c   :  { %1171 = vmatmul.mubr.msk.bf16.vlgmr.msra.gmra.mrb[8].mxu1 %vm235_vm1, %v425_v59 }
 0x31d   :  { %1183 = vmatpush3.bf16.msra.mxu1 %v1620_v10  ;;  %1186 = vmatprep.mubr.msk.bf16.mxu1 %vm1459_vm0, %v1458_v0 }
 0x31e   :  { %1184 = vmatprep.subr.bf16.mxu1 %v1458_v0 }
 0x321   :  { %1185 = vmatpush3.bf16.msra.mxu1 %v1632_v12 }
 0x322   :  { %1198 = vmatprep.subr.bf16.mxu1 %v1458_v0 }
 0x3ef   :  { %v463_v60 = vpop.f32.mrb[8].mxu1 }
 0x3f0   :  { %v464_v61 = vadd.f32 %v1663_v24, %v463_v60  ;;  %v1172_v62 = vpop.f32.mrb[9].mxu1 }
 0x3f1   :  { %v466_v63 = vpop.f32.mrb[10].mxu1 }
 0x3f2   :  { %478 = vrot.lane.b32.xlu1 %v464_v61, %s1454_s15  ;;  %v1173_v1 = vpop.f32.mrb[11].mxu1  ;;  %v470_v5 = vadd.f32 %v469_v4, %v464_v61 }
 0x3f3   :  { %v294_v1 = vadd.f32 %v1653_v16, %v1670_v31 }
 0x3f4   :  { %v1079_v6 = vmul.f32 -1.442695, %v470_v5 }
 0x3f5   :  { %v316_v2 = vpack.c.bf16 %v294_v1, %v294_v1 }
 0x3f6   :  { %1266 = vpow2.f32 %v1079_v6 }
 0x3f7   :  { %v621_v3 = vunpack.c.l.bf16 %v316_v2 }
 0x400   :  { %v1267_v7 = vpop.eup %1266 }
 0x401   :  { %v474_v8 = vadd.f32 1.0, %v1267_v7 }
 0x403   :  { %1268 = vrcp.f32 %v474_v8 }
 0x40d   :  { %v1269_v9 = vpop.eup %1268 }
 0x40e   :  { %v488_v17 = vsub.f32 1.0, %v1269_v9  ;;  %v494_v21 = vmul.f32 %v1269_v9, %v421_v53 }
 0x464   :  { %v479_v11 = vpop.permute.xlu1 %478 }
 0x465   :  { %v481_v14 = vmul.f32 %v1269_v9, %v479_v11 }
 0x467   :  { %483 = vrot.lane.b32.xlu0 %v481_v14, %s1454_s15 }
 0x4d9   :  { %v484_v15 = vpop.permute.xlu0 %483 }
 0x4da   :  { %v486_v18 = vadd.f32 %v484_v15, %v469_v4 }
 0x4dc   :  { %1270 = vtanh.f32 %v486_v18 }
 0x4e6   :  { %v1271_v19 = vpop.eup %1270 }
 0x4e7   :  { %490 = vrot.lane.b32.xlu1 %v1271_v19, %s1461_s4 }
 0x559   :  { %v491_v20 = vpop.permute.xlu1 %490 }
 0x55a   :  { %v493_v22 = vmul.f32 %v491_v20, %v488_v17 }
 0x55c   :  { %v495_v23 = vadd.f32 %v494_v21, %v493_v22 }
 0x55e   :  { %v497_v25 = vsel %vm496_vm4, %v495_v23, %v421_v53 }
 0x55f   :  { %v498_v26 = vpack.c.bf16 %v497_v25, %v497_v25 }
 0x561   :  { %500 = vrot.lane.b32.xlu0 %v498_v26, %s1461_s4 }
 0x5d3   :  { %v501_v27 = vpop.permute.xlu0 %500 }
 0x5d4   :  { %1179 = vmatmul.mubr.msk.bf16.vlgmr.msra.gmra.mrb[8].mxu0 %vm235_vm1, %v501_v27 }
 0x5d5   :  { %1191 = vmatpush3.bf16.msra.mxu0 %v1620_v10  ;;  %1194 = vmatprep.mubr.msk.bf16.mxu0 %vm1459_vm0, %v1458_v0 }
 0x5d6   :  { %1192 = vmatprep.subr.bf16.mxu0 %v1458_v0 }
 0x5d9   :  { %1193 = vmatpush3.bf16.msra.mxu0 %v1632_v12 }
 0x5da   :  { %1206 = vmatprep.subr.bf16.mxu0 %v1458_v0 }
 0x6a7   :  { %v539_v28 = vpop.f32.mrb[8].mxu0 }
 0x6a8   :  { %v540_v29 = vadd.f32 %v1663_v24, %v539_v28  ;;  %v1180_v30 = vpop.f32.mrb[9].mxu0 }
 0x6a9   :  { %v542_v32 = vpop.f32.mrb[10].mxu0 }
 0x6aa   :  { %554 = vrot.lane.b32.xlu1 %v540_v29, %s1454_s15  ;;  %v1181_v33 = vpop.f32.mrb[11].mxu0  ;;  %v546_v37 = vadd.f32 %v545_v36, %v540_v29  ;;  %v299_v32 = vadd.f32 %v1670_v31, %v1685_v56 }
 0x6ac   :  { %v1081_v38 = vmul.f32 -1.442695, %v546_v37  ;;  %v317_v33 = vpack.c.bf16 %v299_v32, %v299_v32 }
 0x6ae   :  { %1272 = vpow2.f32 %v1081_v38  ;;  %v697_v34 = vunpack.c.l.bf16 %v317_v33 }
 0x6b8   :  { %v1273_v39 = vpop.eup %1272 }
 0x6b9   :  { %v550_v40 = vadd.f32 1.0, %v1273_v39 }
 0x6bb   :  { %1274 = vrcp.f32 %v550_v40 }
 0x6c5   :  { %v1275_v41 = vpop.eup %1274 }
 0x6c6   :  { %v564_v13 = vsub.f32 1.0, %v1275_v41  ;;  %v570_v49 = vmul.f32 %v1275_v41, %v497_v25 }
 0x71c   :  { %v555_v42 = vpop.permute.xlu1 %554 }
 0x71d   :  { %v557_v43 = vmul.f32 %v1275_v41, %v555_v42 }
 0x71f   :  { %559 = vrot.lane.b32.xlu0 %v557_v43, %s1454_s15 }
 0x791   :  { %v560_v44 = vpop.permute.xlu0 %559 }
 0x792   :  { %v562_v45 = vadd.f32 %v560_v44, %v545_v36 }
 0x794   :  { %1276 = vtanh.f32 %v562_v45 }
 0x79e   :  { %v1277_v46 = vpop.eup %1276 }
 0x79f   :  { %566 = vrot.lane.b32.xlu1 %v1277_v46, %s1461_s4 }
 0x811   :  { %v567_v48 = vpop.permute.xlu1 %566 }
 0x812   :  { %v569_v50 = vmul.f32 %v567_v48, %v564_v13 }
 0x814   :  { %v571_v51 = vadd.f32 %v570_v49, %v569_v50 }
 0x816   :  { %v573_v52 = vsel %vm572_vm5, %v571_v51, %v497_v25 }
 0x817   :  { %v574_v53 = vpack.c.bf16 %v573_v52, %v573_v52 }
 0x819   :  { %576 = vrot.lane.b32.xlu0 %v574_v53, %s1461_s4 }
 0x88b   :  { %v577_v54 = vpop.permute.xlu0 %576 }
 0x88c   :  { %1187 = vmatmul.mubr.msk.bf16.vlgmr.msra.gmra.mrb[12].mxu1 %vm235_vm1, %v577_v54 }
 0x88d   :  { %1199 = vmatpush3.bf16.msra.mxu1 %v1620_v10  ;;  %1202 = vmatprep.mubr.msk.bf16.mxu1 %vm1459_vm0, %v1458_v0 }
 0x88e   :  { %1200 = vmatprep.subr.bf16.mxu1 %v1458_v0 }
 0x891   :  { %1201 = vmatpush3.bf16.msra.mxu1 %v1632_v12 }
 0x892   :  { %1214 = vmatprep.subr.bf16.mxu1 %v1458_v0 }
 0x95f   :  { %v615_v59 = vpop.f32.mrb[12].mxu1 }
 0x960   :  { %v616_v60 = vadd.f32 %v1663_v24, %v615_v59  ;;  %v1188_v61 = vpop.f32.mrb[13].mxu1 }
 0x961   :  { %v618_v62 = vpop.f32.mrb[14].mxu1  ;;  %v302_v61 = vadd.f32 %v1670_v31, %v1689_v58 }
 0x962   :  { %630 = vrot.lane.b32.xlu1 %v616_v60, %s1454_s15  ;;  %v1189_v63 = vpop.f32.mrb[15].mxu1  ;;  %v622_v4 = vadd.f32 %v621_v3, %v616_v60 }
 0x963   :  { %v318_v62 = vpack.c.bf16 %v302_v61, %v302_v61 }
 0x964   :  { %v1083_v5 = vmul.f32 -1.442695, %v622_v4 }
 0x966   :  { %1278 = vpow2.f32 %v1083_v5 }
 0x970   :  { %v1279_v6 = vpop.eup %1278 }
 0x971   :  { %v626_v7 = vadd.f32 1.0, %v1279_v6 }
 0x973   :  { %1280 = vrcp.f32 %v626_v7 }
 0x97d   :  { %v1281_v8 = vpop.eup %1280 }
 0x97e   :  { %v640_v16 = vsub.f32 1.0, %v1281_v8  ;;  %v646_v17 = vmul.f32 %v1281_v8, %v573_v52 }
 0x9d4   :  { %v631_v9 = vpop.permute.xlu1 %630 }
 0x9d5   :  { %v633_v11 = vmul.f32 %v1281_v8, %v631_v9 }
 0x9d7   :  { %635 = vrot.lane.b32.xlu0 %v633_v11, %s1454_s15 }
 0xa49   :  { %v636_v14 = vpop.permute.xlu0 %635 }
 0xa4a   :  { %v638_v15 = vadd.f32 %v636_v14, %v621_v3 }
 0xa4c   :  { %1282 = vtanh.f32 %v638_v15 }
 0xa56   :  { %v1283_v18 = vpop.eup %1282 }
 0xa57   :  { %642 = vrot.lane.b32.xlu1 %v1283_v18, %s1461_s4 }
 0xac9   :  { %v643_v19 = vpop.permute.xlu1 %642 }
 0xaca   :  { %v645_v20 = vmul.f32 %v643_v19, %v640_v16 }
 0xacc   :  { %v647_v21 = vadd.f32 %v646_v17, %v645_v20 }
 0xace   :  { %v649_v22 = vsel %vm648_vm6, %v647_v21, %v573_v52 }
 0xacf   :  { %v650_v23 = vpack.c.bf16 %v649_v22, %v649_v22 }
 0xad1   :  { %652 = vrot.lane.b32.xlu0 %v650_v23, %s1461_s4 }
 0xb43   :  { %v653_v25 = vpop.permute.xlu0 %652 }
 0xb44   :  { %1195 = vmatmul.mubr.msk.bf16.vlgmr.msra.gmra.mrb[12].mxu0 %vm235_vm1, %v653_v25  ;;  %v307_v25 = vadd.f32 %v1683_v55, %v1670_v31 }
 0xb45   :  { %1207 = vmatpush3.bf16.msra.mxu0 %v1620_v10  ;;  %1210 = vmatprep.mubr.msk.bf16.mxu0 %vm1459_vm0, %v1458_v0 }
 0xb46   :  { %1208 = vmatprep.subr.bf16.mxu0 %v1458_v0 }
 0xb49   :  { %1209 = vmatpush3.bf16.msra.mxu0 %v1632_v12 }
 0xb4a   :  { %1222 = vmatprep.subr.bf16.mxu0 %v1458_v0 }
 0xc17   :  { %v691_v26 = vpop.f32.mrb[12].mxu0 }
 0xc18   :  { %v692_v27 = vadd.f32 %v1663_v24, %v691_v26  ;;  %v1196_v28 = vpop.f32.mrb[13].mxu0  ;;  %v319_v26 = vpack.c.bf16 %v307_v25, %v307_v25 }
 0xc19   :  { %v694_v29 = vpop.f32.mrb[14].mxu0 }
 0xc1a   :  { %706 = vrot.lane.b32.xlu1 %v692_v27, %s1454_s15  ;;  %v1197_v30 = vpop.f32.mrb[15].mxu0  ;;  %v698_v35 = vadd.f32 %v697_v34, %v692_v27  ;;  %v849_v27 = vunpack.c.l.bf16 %v319_v26 }
 0xc1c   :  { %v1085_v36 = vmul.f32 -1.442695, %v698_v35 }
 0xc1e   :  { %1284 = vpow2.f32 %v1085_v36 }
 0xc28   :  { %v1285_v37 = vpop.eup %1284 }
 0xc29   :  { %v702_v38 = vadd.f32 1.0, %v1285_v37 }
 0xc2b   :  { %1286 = vrcp.f32 %v702_v38 }
 0xc35   :  { %v1287_v39 = vpop.eup %1286 }
 0xc36   :  { %v716_v56 = vsub.f32 1.0, %v1287_v39  ;;  %v722_v46 = vmul.f32 %v1287_v39, %v649_v22 }
 0xc8c   :  { %v707_v40 = vpop.permute.xlu1 %706 }
 0xc8d   :  { %v709_v41 = vmul.f32 %v1287_v39, %v707_v40 }
 0xc8f   :  { %711 = vrot.lane.b32.xlu0 %v709_v41, %s1454_s15 }
 0xd01   :  { %v712_v42 = vpop.permute.xlu0 %711 }
 0xd02   :  { %v714_v43 = vadd.f32 %v712_v42, %v697_v34 }
 0xd04   :  { %1288 = vtanh.f32 %v714_v43 }
 0xd0e   :  { %v1289_v44 = vpop.eup %1288 }
 0xd0f   :  { %718 = vrot.lane.b32.xlu1 %v1289_v44, %s1461_s4 }
 0xd81   :  { %v719_v45 = vpop.permute.xlu1 %718 }
 0xd82   :  { %v721_v13 = vmul.f32 %v719_v45, %v716_v56 }
 0xd84   :  { %v723_v48 = vadd.f32 %v722_v46, %v721_v13 }
 0xd86   :  { %v725_v49 = vsel %vm724_vm7, %v723_v48, %v649_v22 }
 0xd87   :  { %v726_v50 = vpack.c.bf16 %v725_v49, %v725_v49 }
 0xd89   :  { %728 = vrot.lane.b32.xlu0 %v726_v50, %s1461_s4  ;;  %v310_v50 = vadd.f32 %v1687_v57, %v1670_v31 }
 0xdfb   :  { %v729_v51 = vpop.permute.xlu0 %728 }
 0xdfc   :  { %1203 = vmatmul.mubr.msk.bf16.vlgmr.msra.gmra.mrb[16].mxu1 %vm235_vm1, %v729_v51  ;;  %v320_v51 = vpack.c.bf16 %v310_v50, %v310_v50 }
 0xdfd   :  { %1215 = vmatpush3.bf16.msra.mxu1 %v1620_v10  ;;  %1218 = vmatprep.mubr.msk.bf16.mxu1 %vm1459_vm0, %v1458_v0  ;;  %v773_v10 = vunpack.c.l.bf16 %v318_v62 }
 0xdfe   :  { %1216 = vmatprep.subr.bf16.mxu1 %v1458_v0 }
 0xe01   :  { %1217 = vmatpush3.bf16.msra.mxu1 %v1632_v12 }
 0xecf   :  { %v767_v52 = vpop.f32.mrb[16].mxu1 }
 0xed0   :  { %v768_v53 = vadd.f32 %v1663_v24, %v767_v52  ;;  %v1204_v54 = vpop.f32.mrb[17].mxu1  ;;  %v925_v52 = vunpack.c.l.bf16 %v320_v51 }
 0xed1   :  { %v770_v59 = vpop.f32.mrb[18].mxu1 }
 0xed2   :  { %782 = vrot.lane.b32.xlu1 %v768_v53, %s1454_s15  ;;  %v1205_v60 = vpop.f32.mrb[19].mxu1  ;;  %v774_v63 = vadd.f32 %v773_v10, %v768_v53 }
 0xed4   :  { %v1087_v1 = vmul.f32 -1.442695, %v774_v63 }
 0xed6   :  { %1290 = vpow2.f32 %v1087_v1  ;;  %v1256_v1 = vld [vmem:[#allocation8] sm:$0xff]  }
 0xee0   :  { %v1291_v2 = vpop.eup %1290 }
 0xee1   :  { %v778_v3 = vadd.f32 1.0, %v1291_v2  ;;  %v1257_v2 = vld [vmem:[#allocation8 + $0x8] sm:$0xff]  }
 0xee3   :  { %1292 = vrcp.f32 %v778_v3 }
 0xeed   :  { %v1293_v12 = vpop.eup %1292 }
 0xeee   :  { %v792_v58 = vsub.f32 1.0, %v1293_v12  ;;  %v798_v11 = vmul.f32 %v1293_v12, %v725_v49 }
 0xf44   :  { %v783_v4 = vpop.permute.xlu1 %782 }
 0xf45   :  { %v785_v5 = vmul.f32 %v1293_v12, %v783_v4 }
 0xf47   :  { %787 = vrot.lane.b32.xlu0 %v785_v5, %s1454_s15 }
 0xfb9   :  { %v788_v6 = vpop.permute.xlu0 %787 }
 0xfba   :  { %v790_v7 = vadd.f32 %v788_v6, %v773_v10 }
 0xfbc   :  { %1294 = vtanh.f32 %v790_v7 }
 0xfc6   :  { %v1295_v8 = vpop.eup %1294 }
 0xfc7   :  { %794 = vrot.lane.b32.xlu1 %v1295_v8, %s1461_s4 }
0x1039   :  { %v795_v9 = vpop.permute.xlu1 %794 }
0x103a   :  { %v797_v14 = vmul.f32 %v795_v9, %v792_v58 }
0x103c   :  { %v799_v15 = vadd.f32 %v798_v11, %v797_v14 }
0x103e   :  { %v801_v18 = vsel %vm800_vm8, %v799_v15, %v725_v49 }
0x103f   :  { %v802_v16 = vpack.c.bf16 %v801_v18, %v801_v18 }
0x1041   :  { %804 = vrot.lane.b32.xlu0 %v802_v16, %s1461_s4 }
0x10b3   :  { %v805_v19 = vpop.permute.xlu0 %804 }
0x10b4   :  { %1211 = vmatmul.mubr.msk.bf16.vlgmr.msra.gmra.mrb[16].mxu0 %vm235_vm1, %v805_v19 }
0x10b5   :  { %1226 = vmatprep.mubr.msk.bf16.mxu0 %vm1459_vm0, %v1458_v0  ;;  %1223 = vmatpush3.bf16.msra.mxu0 %v1256_v1 }
0x10b6   :  { %1224 = vmatprep.subr.bf16.mxu0 %v1458_v0 }
0x10b9   :  { %1225 = vmatpush3.bf16.msra.mxu0 %v1257_v2 }
0x1187   :  { %v843_v17 = vpop.f32.mrb[16].mxu0 }
0x1188   :  { %v844_v20 = vadd.f32 %v1663_v24, %v843_v17  ;;  %v1212_v21 = vpop.f32.mrb[17].mxu0 }
0x1189   :  { %v846_v22 = vpop.f32.mrb[18].mxu0 }
0x118a   :  { %858 = vrot.lane.b32.xlu1 %v844_v20, %s1454_s15  ;;  %v1213_v23 = vpop.f32.mrb[19].mxu0  ;;  %v850_v28 = vadd.f32 %v849_v27, %v844_v20 }
0x118c   :  { %v1089_v29 = vmul.f32 -1.442695, %v850_v28 }
0x118e   :  { %1296 = vpow2.f32 %v1089_v29 }
0x1198   :  { %v1297_v30 = vpop.eup %1296 }
0x1199   :  { %v854_v32 = vadd.f32 1.0, %v1297_v30 }
0x119b   :  { %1298 = vrcp.f32 %v854_v32 }
0x11a5   :  { %v1299_v33 = vpop.eup %1298 }
0x11a6   :  { %v868_v55 = vsub.f32 1.0, %v1299_v33  ;;  %v874_v40 = vmul.f32 %v1299_v33, %v801_v18 }
0x11fc   :  { %v859_v34 = vpop.permute.xlu1 %858 }
0x11fd   :  { %v861_v35 = vmul.f32 %v1299_v33, %v859_v34 }
0x11ff   :  { %863 = vrot.lane.b32.xlu0 %v861_v35, %s1454_s15 }
0x1271   :  { %v864_v36 = vpop.permute.xlu0 %863 }
0x1272   :  { %v866_v37 = vadd.f32 %v864_v36, %v849_v27 }
0x1274   :  { %1300 = vtanh.f32 %v866_v37 }
0x127e   :  { %v1301_v38 = vpop.eup %1300 }
0x127f   :  { %870 = vrot.lane.b32.xlu1 %v1301_v38, %s1461_s4 }
0x12f1   :  { %v871_v39 = vpop.permute.xlu1 %870 }
0x12f2   :  { %v873_v41 = vmul.f32 %v871_v39, %v868_v55 }
0x12f4   :  { %v875_v42 = vadd.f32 %v874_v40, %v873_v41 }
0x12f6   :  { %v877_v43 = vsel %vm876_vm9, %v875_v42, %v801_v18 }
0x12f7   :  { %v878_v44 = vpack.c.bf16 %v877_v43, %v877_v43 }
0x12f9   :  { %880 = vrot.lane.b32.xlu0 %v878_v44, %s1461_s4 }
0x136b   :  { %v881_v56 = vpop.permute.xlu0 %880 }
0x136c   :  { %1219 = vmatmul.mubr.msk.bf16.vlgmr.msra.gmra.mrb[20].mxu1 %vm235_vm1, %v881_v56 }
0x143f   :  { %v919_v45 = vpop.f32.mrb[20].mxu1 }
0x1440   :  { %v920_v46 = vadd.f32 %v1663_v24, %v919_v45  ;;  %v1220_v13 = vpop.f32.mrb[21].mxu1 }
0x1441   :  { %v922_v48 = vpop.f32.mrb[22].mxu1 }
0x1442   :  { %934 = vrot.lane.b32.xlu1 %v920_v46, %s1454_s15  ;;  %v1221_v49 = vpop.f32.mrb[23].mxu1  ;;  %v926_v53 = vadd.f32 %v925_v52, %v920_v46 }
0x1444   :  { %v1091_v54 = vmul.f32 -1.442695, %v926_v53 }
0x1446   :  { %1302 = vpow2.f32 %v1091_v54 }
0x1450   :  { %v1303_v59 = vpop.eup %1302 }
0x1451   :  { %v930_v60 = vadd.f32 1.0, %v1303_v59 }
0x1453   :  { %1304 = vrcp.f32 %v930_v60 }
0x145d   :  { %v1305_v61 = vpop.eup %1304 }
0x145e   :  { %v944_v57 = vsub.f32 1.0, %v1305_v61  ;;  %v950_v12 = vmul.f32 %v1305_v61, %v877_v43 }
0x14b4   :  { %v935_v62 = vpop.permute.xlu1 %934 }
0x14b5   :  { %v937_v10 = vmul.f32 %v1305_v61, %v935_v62 }
0x14b7   :  { %939 = vrot.lane.b32.xlu0 %v937_v10, %s1454_s15  ;;  %s1042_s15 = sshll.u32 %s1462_s5, 4  ;;  %s1043_s15 = int_to_ptr.vmem [resolvable:$true] %s1042_s15 }
0x14b8   :  { %s1398_s22 = scalar_lea.vmem %s1043_s15, 128  ;;  %p1403_p5 = scmp.lt.s32.totalorder %s1043_s15, %s1043_s15 }
0x14b9   :  { %p1399_p4 = scmp.ne.s32.totalorder %s1043_s15, %s1398_s22  ;;  %p1404_p6 = scmp.lt.s32.totalorder %s1398_s22, %s1398_s22 }
0x14bb   :  { %p1405_p7 = por %p1404_p6, %p1403_p5 }
0x14bd   :  { %p1406_p8 = pnand %p1405_p7, %p1399_p4 }
0x1529   :  { %v940_v24 = vpop.permute.xlu0 %939 }
0x152a   :  { %v942_v63 = vadd.f32 %v940_v24, %v925_v52 }
0x152c   :  { %1306 = vtanh.f32 %v942_v63 }
0x1536   :  { %v1307_v31 = vpop.eup %1306 }
0x1537   :  { %946 = vrot.lane.b32.xlu1 %v1307_v31, %s1461_s4 }
0x15a9   :  { %v947_v3 = vpop.permute.xlu1 %946 }
0x15aa   :  { %v949_v4 = vmul.f32 %v947_v3, %v944_v57 }
0x15ac   :  { %v951_v5 = vadd.f32 %v950_v12, %v949_v4 }
0x15ae   :  { %v953_v6 = vsel %vm952_vm10, %v951_v5, %v877_v43 }
0x15af   :  { %v954_v7 = vpack.c.bf16 %v953_v6, %v953_v6 }
0x15b1   :  { %967 = vrot.lane.b32.xlu0 %v954_v7, %s1461_s4 }
0x1623   :  { %v968_v8 = vpop.permute.xlu0 %967 }
0x1624   :  { %1227 = vmatmul.mubr.msk.bf16.vlgmr.msra.gmra.mrb[20].mxu0 %vm235_vm1, %v968_v8 }
0x1625   :  { %1409 = shalt.err (!%p1406_p8)
}
0x1626   :  { %s1410_s17 = scalar_lea.hbm %s1826_s12, 128 }
0x1627   :  { %p1411_p9 = scmp.ne.s32.totalorder %s1826_s12, %s1410_s17  ;;  %p1414_p10 = scmp.lt.u32.totalorder %s1410_s17, %s1826_s12 }
0x1629   :  { %p1416_p11 = pnand %p1414_p10, %p1411_p9 }
0x162b   :  { %1419 = shalt.err (!%p1416_p11)
}
0x162c   :  { %1045 = dma.vmem_to_hbm [thread:$0]  %s1043_s15, 128, %s1826_s12, [#allocation12]   ;;  %v1092_v0 = vld [vmem:[%s1821_s7] ss:$0 sm:$0xff] }
0x162d   :  { %s1463_s21 = smov [#allocation10]  }
0x162e   :  { %s1032_s23 = sshll.u32 %s1463_s21, 4  ;;  %s1033_s23 = int_to_ptr.vmem [resolvable:$true] %s1032_s23 }
0x162f   :  { %s1420_s25 = scalar_lea.vmem %s1033_s23, 128  ;;  %p1425_p13 = scmp.lt.s32.totalorder %s1033_s23, %s1033_s23 }
0x1630   :  { %p1421_p12 = scmp.ne.s32.totalorder %s1033_s23, %s1420_s25  ;;  %p1426_p0 = scmp.lt.s32.totalorder %s1420_s25, %s1420_s25 }
0x1632   :  { %p1427_p1 = por %p1426_p0, %p1425_p13 }
0x1634   :  { %p1428_p2 = pnand %p1427_p1, %p1421_p12 }
0x16f7   :  { %v1018_v47 = vpop.f32.mrb[20].mxu0 }
0x16f8   :  { %v1019_v58 = vadd.f32 %v1092_v0, %v1018_v47  ;;  %v1228_v9 = vpop.f32.mrb[21].mxu0 }
0x16f9   :  { %v1021_v11 = vpop.f32.mrb[22].mxu0 }
0x16fa   :  { %1308 = vtanh.f32 %v1019_v58  ;;  %v1229_v14 = vpop.f32.mrb[23].mxu0 }
0x1704   :  { %v1309_v15 = vpop.eup %1308 }
0x1705   :  { %1025 = vst [vmem:[#allocation10] sm:$0xff] %v1309_v15 }
0x1706   :  { %1431 = shalt.err (!%p1428_p2)
}
0x1707   :  { %s1432_s0 = scalar_lea.hbm %s1825_s11, 128 }
0x1708   :  { %p1433_p3 = scmp.ne.s32.totalorder %s1825_s11, %s1432_s0  ;;  %p1436_p4 = scmp.lt.u32.totalorder %s1432_s0, %s1825_s11 }
0x170a   :  { %p1438_p5 = pnand %p1436_p4, %p1433_p3 }
0x170c   :  { %1441 = shalt.err (!%p1438_p5)
}
0x170d   :  { %1035 = dma.vmem_to_hbm [thread:$0]  %s1033_s23, 128, %s1825_s11, [#allocation4]  }
0x170e   :  { %1448 = dma.done.wait [#allocation4], 128  }
0x170f   :  { %1449 = vsyncadd [#allocation4], 4294967168 }
0x1710   :  { %1450 = dma.done.wait [#allocation12], 128  }
0x1711   :  { %1451 = vsyncadd [#allocation12], 4294967168 }
0x1712   :  { %1052 = vsyncpa [#allocation3], 1 }
0x1713   :  { %1053 = vsyncpa [#allocation6], 1 }
0x1714   :  { %1054 = vsyncpa [#allocation9], 1 }
0x1715   :  { %1055 = vsyncpa [#allocation4], 1 }
0x1716   :  { %1056 = vsyncpa [#allocation12], 1 }

</bundles_post_ra>
